<compile_context>
chip_gen: v7x
topology: tpu7x:2x2x1
jax: 0.10.0
libtpu: 0.0.40
codegen_flags: <defaults>
</compile_context>

<pallas_src>
import functools
import math

import jax
import jax.numpy as jnp
from jax import lax
from jax.experimental import pallas as pl
from jax.experimental.pallas import tpu as pltpu

D_MODEL = 32
NHEAD = 4
HEAD_DIM = D_MODEL // NHEAD
LN_EPS = 1e-5

# Packed-parameter buffer layout (f32, shape (40, 128)):
#   rows 0:32   -> [ Wq*scale | Wk | Wv | Wo ]          (lane blocks of 32)
#   row  32     -> [ bq*scale | bk | bv | bo ]
#   row  33     -> [ gamma    | beta | 0 | 0 ]
#   rows 34:40  -> zero padding (sublane multiple of 8)
_PACK_ROWS = 40
_PACK_COLS = 128


def _cross_attn_kernel(batch, lq, lk, has_qpos, has_pos, *refs):
    """Whole layer: QKV proj, per-(batch,head) attention, out proj, residual, LN."""
    it = iter(refs)
    tgt_ref = next(it)                                   # (B, Lq, D)
    qin_ref = next(it) if has_qpos else None             # (B, Lq, D) = tgt + query_pos
    mem_ref = next(it)                                   # (B, Lk, D)
    kin_ref = next(it) if has_pos else None              # (B, Lk, D) = memory + pos
    p_ref = next(it)                                     # (40, 128) packed params
    out_ref = next(it)                                   # (B, Lq, D)

    d = D_MODEL
    hd = HEAD_DIM

    # --- single vector load of the packed params; static slices are free views
    P = p_ref[...]
    wq = P[0:d, 0:d]                    # scale pre-folded
    wo = P[0:d, 3 * d:4 * d]
    bq = P[d:d + 1, 0:d]                # scale pre-folded
    bo = P[d:d + 1, 3 * d:4 * d]
    gamma = P[d + 1:d + 2, 0:d]
    beta = P[d + 1:d + 2, d:2 * d]

    # --- activations: contiguous (B*L, D) row blocks (no strided batch slicing)
    tgt = tgt_ref[...].reshape(batch * lq, d).astype(jnp.float32)
    q_src = (qin_ref[...].reshape(batch * lq, d).astype(jnp.float32)
             if has_qpos else tgt)
    mem = mem_ref[...].reshape(batch * lk, d).astype(jnp.float32)

    # --- projections: 2-3 wide matmuls total (instead of 24 tiny per-head ones)
    q_all = jnp.dot(q_src, wq, preferred_element_type=jnp.float32) + bq   # (B*Lq, D)
    if has_pos:
        k_src = kin_ref[...].reshape(batch * lk, d).astype(jnp.float32)
        wk = P[0:d, d:2 * d]
        wv = P[0:d, 2 * d:3 * d]
        bk = P[d:d + 1, d:2 * d]
        bv = P[d:d + 1, 2 * d:3 * d]
        k_all = jnp.dot(k_src, wk, preferred_element_type=jnp.float32) + bk
        v_all = jnp.dot(mem, wv, preferred_element_type=jnp.float32) + bv
    else:
        # fused K|V: one (B*Lk, 32) @ (32, 64) matmul
        wkv = P[0:d, d:3 * d]
        bkv = P[d:d + 1, d:3 * d]
        kv = jnp.dot(mem, wkv, preferred_element_type=jnp.float32) + bkv  # (B*Lk, 2D)
        k_all = kv[:, 0:d]
        v_all = kv[:, d:2 * d]

    # --- attention: tiny per-(batch, head) tiles (static unroll; B=2, H=4)
    o_rows = []
    for b in range(batch):
        qb = q_all[b * lq:(b + 1) * lq]       # (Lq, D) sublane slice, mult. of 8
        kb = k_all[b * lk:(b + 1) * lk]
        vb = v_all[b * lk:(b + 1) * lk]
        o_heads = []
        for h in range(NHEAD):
            sl = slice(h * hd, (h + 1) * hd)
            s = jnp.einsum('qd,kd->qk', qb[:, sl], kb[:, sl],
                           preferred_element_type=jnp.float32)   # (Lq, Lk)
            s = s - jnp.max(s, axis=-1, keepdims=True)
            p = jnp.exp(s)
            denom = jnp.sum(p, axis=-1, keepdims=True)
            r = pl.reciprocal(denom, approx=True)                # EUP slot (cheap)
            r = r * (2.0 - denom * r)                            # 1 Newton step -> full f32
            p = p * r
            o_heads.append(jnp.dot(p, vb[:, sl],
                                   preferred_element_type=jnp.float32))  # (Lq, hd)
        o_rows.append(jnp.concatenate(o_heads, axis=-1))          # (Lq, D)
    o_all = jnp.concatenate(o_rows, axis=0)                       # (B*Lq, D)

    # --- single merged output projection
    attn = jnp.dot(o_all, wo, preferred_element_type=jnp.float32) + bo   # (B*Lq, D)

    # --- residual + LayerNorm (dropout == 0 -> identity)
    x = tgt + attn
    mean = jnp.mean(x, axis=-1, keepdims=True)
    var = jnp.mean(jnp.square(x - mean), axis=-1, keepdims=True)
    y = (x - mean) * lax.rsqrt(var + LN_EPS)
    y = y * gamma + beta

    # single full-block, unmasked store
    out_ref[...] = y.reshape(batch, lq, d).astype(out_ref.dtype)


def _full_spec(shape):
    zeros = (0,) * len(shape)
    return pl.BlockSpec(shape, lambda i: zeros)


def cross_attention_layer(tgt, memory, packed_params, pos=None, query_pos=None):
    """tgt: (Lq, B, D), memory: (Lk, B, D) seq-major (PyTorch layout).

    Returns (Lq, B, D).  memory_mask / memory_key_padding_mask unsupported.
    """
    Lq, B, D = tgt.shape
    Lk = memory.shape[0]
    assert D == D_MODEL

    has_qpos = query_pos is not None
    has_pos = pos is not None

    # TODO(synk): memory_mask / memory_key_padding_mask unsupported (None path only).
    # TODO(synk): for DETR-sized memory, add an Lk grid axis with online-softmax
    #             accumulation; size K/V tiles against v7x's 64 MiB physical /
    #             32 MiB default-scoped VMEM (x2 double-buffering per input).

    # Cheap batch-major relayout at the boundary (removes in-kernel sublane
    # gathers on the strided middle axis); pos adds folded here too.
    tgt_bm = jnp.transpose(tgt, (1, 0, 2))          # (B, Lq, D)
    mem_bm = jnp.transpose(memory, (1, 0, 2))       # (B, Lk, D)

    inputs = [tgt_bm]
    in_specs = [_full_spec((B, Lq, D))]
    if has_qpos:
        inputs.append(tgt_bm + jnp.transpose(query_pos, (1, 0, 2)))
        in_specs.append(_full_spec((B, Lq, D)))
    inputs.append(mem_bm)
    in_specs.append(_full_spec((B, Lk, D)))
    if has_pos:
        inputs.append(mem_bm + jnp.transpose(pos, (1, 0, 2)))
        in_specs.append(_full_spec((B, Lk, D)))
    inputs.append(packed_params)
    in_specs.append(_full_spec((_PACK_ROWS, _PACK_COLS)))

    kernel = functools.partial(_cross_attn_kernel, B, Lq, Lk, has_qpos, has_pos)

    out_bm = pl.pallas_call(
        kernel,
        out_shape=jax.ShapeDtypeStruct((B, Lq, D), tgt.dtype),
        grid=(1,),  # whole few-KB problem in one step; single TC on all gens
        in_specs=in_specs,
        out_specs=_full_spec((B, Lq, D)),
        compiler_params=pltpu.CompilerParams(
            dimension_semantics=("arbitrary",)),
    )(*inputs)

    return jnp.transpose(out_bm, (1, 0, 2))         # back to seq-major (Lq, B, D)


def prepare_params(raw):
    """Host-side (one-time) pack of all parameters into one (40, 128) buffer."""
    scale = 1.0 / math.sqrt(HEAD_DIM)
    P = jnp.zeros((_PACK_ROWS, _PACK_COLS), jnp.float32)
    P = P.at[0:D_MODEL, 0:D_MODEL].set(raw["wq"] * scale)
    P = P.at[0:D_MODEL, D_MODEL:2 * D_MODEL].set(raw["wk"])
    P = P.at[0:D_MODEL, 2 * D_MODEL:3 * D_MODEL].set(raw["wv"])
    P = P.at[0:D_MODEL, 3 * D_MODEL:4 * D_MODEL].set(raw["wo"])
    bias_row = jnp.concatenate(
        [raw["bq"] * scale, raw["bk"], raw["bv"], raw["bo"]], axis=1)      # (1, 128)
    P = P.at[D_MODEL:D_MODEL + 1, :].set(bias_row)
    ln_row = jnp.concatenate(
        [raw["gamma"], raw["beta"], jnp.zeros((1, 2 * D_MODEL), jnp.float32)],
        axis=1)                                                            # (1, 128)
    P = P.at[D_MODEL + 1:D_MODEL + 2, :].set(ln_row)
    return P


def _reference(tgt, memory, raw, pos, query_pos):
    """Pure-JAX reference mirroring PyTorch MultiheadAttention + LayerNorm."""
    q_in = tgt + query_pos
    k_in = memory + pos
    v_in = memory
    q = jnp.einsum("lbd,de->lbe", q_in, raw["wq"]) + raw["bq"][0]
    k = jnp.einsum("lbd,de->lbe", k_in, raw["wk"]) + raw["bk"][0]
    v = jnp.einsum("lbd,de->lbe", v_in, raw["wv"]) + raw["bv"][0]
    Lq, B, D = q.shape
    Lk = k.shape[0]
    qh = q.reshape(Lq, B, NHEAD, HEAD_DIM)
    kh = k.reshape(Lk, B, NHEAD, HEAD_DIM)
    vh = v.reshape(Lk, B, NHEAD, HEAD_DIM)
    s = jnp.einsum("qbhd,kbhd->bhqk", qh, kh) / math.sqrt(HEAD_DIM)
    p = jax.nn.softmax(s, axis=-1)
    o = jnp.einsum("bhqk,kbhd->qbhd", p, vh).reshape(Lq, B, D)
    o = jnp.einsum("lbd,de->lbe", o, raw["wo"]) + raw["bo"][0]
    x = tgt + o
    mean = jnp.mean(x, axis=-1, keepdims=True)
    var = jnp.mean((x - mean) ** 2, axis=-1, keepdims=True)
    y = (x - mean) / jnp.sqrt(var + LN_EPS)
    return y * raw["gamma"][0] + raw["beta"][0]


def _xavier(key, shape):
    fan_in, fan_out = shape[0], shape[1]
    a = math.sqrt(6.0 / (fan_in + fan_out))
    return jax.random.uniform(key, shape, jnp.float32, -a, a)


if __name__ == "__main__":
    key = jax.random.PRNGKey(0)
    keys = jax.random.split(key, 8)

    Lq, Lk, B = 8, 8, 2

    raw = {
        "wq": _xavier(keys[0], (D_MODEL, D_MODEL)),
        "wk": _xavier(keys[1], (D_MODEL, D_MODEL)),
        "wv": _xavier(keys[2], (D_MODEL, D_MODEL)),
        "wo": _xavier(keys[3], (D_MODEL, D_MODEL)),
        "bq": jnp.zeros((1, D_MODEL), jnp.float32),
        "bk": jnp.zeros((1, D_MODEL), jnp.float32),
        "bv": jnp.zeros((1, D_MODEL), jnp.float32),
        "bo": jnp.zeros((1, D_MODEL), jnp.float32),
        "gamma": jnp.ones((1, D_MODEL), jnp.float32),
        "beta": jnp.zeros((1, D_MODEL), jnp.float32),
    }
    packed = prepare_params(raw)

    tgt = jax.random.normal(keys[4], (Lq, B, D_MODEL), jnp.float32)
    memory = jax.random.normal(keys[5], (Lk, B, D_MODEL), jnp.float32)
    query_pos = 0.1 * jax.random.normal(keys[6], (Lq, B, D_MODEL), jnp.float32)
    pos = 0.1 * jax.random.normal(keys[7], (Lk, B, D_MODEL), jnp.float32)

    # Path with positional embeddings.
    out = cross_attention_layer(tgt, memory, packed, pos=pos, query_pos=query_pos)
    out = jax.block_until_ready(out)
    ref = _reference(tgt, memory, raw, pos, query_pos)
    assert out.shape == (Lq, B, D_MODEL)
    assert jnp.allclose(out, ref, atol=1e-4, rtol=1e-4), "mismatch (pos path)"

    # Specialized no-positional-embedding path (fused K|V matmul, fewer inputs).
    out_np = cross_attention_layer(tgt, memory, packed)
    out_np = jax.block_until_ready(out_np)
    ref_np = _reference(tgt, memory, raw,
                        jnp.zeros_like(memory), jnp.zeros_like(tgt))
    assert jnp.allclose(out_np, ref_np, atol=1e-4, rtol=1e-4), "mismatch (no-pos path)"

    print("KERNEL_OK")
</pallas_src>

<mosaic_0001>
module attributes {stable_mosaic.version = 11 : i64} {
  func.func @_cross_attn_kernel(%arg0: i32, %arg1: memref<2x8x32xf32, #tpu.memory_space<vmem>>, %arg2: memref<2x8x32xf32, #tpu.memory_space<vmem>>, %arg3: memref<2x8x32xf32, #tpu.memory_space<vmem>>, %arg4: memref<2x8x32xf32, #tpu.memory_space<vmem>>, %arg5: memref<40x128xf32, #tpu.memory_space<vmem>>, %arg6: memref<2x8x32xf32, #tpu.memory_space<vmem>>) attributes {dimension_semantics = [#tpu.dimension_semantics<arbitrary>], iteration_bounds = array<i64: 1>, scalar_prefetch = 0 : i64, scratch_operands = 0 : i64, tpu.core_type = #tpu.core_type<tc>, window_params = [{pipeline_mode = #tpu.pipeline_mode<synchronous>, transform_indices = @transform_0, window_bounds = array<i64: 2, 8, 32>}, {pipeline_mode = #tpu.pipeline_mode<synchronous>, transform_indices = @transform_1, window_bounds = array<i64: 2, 8, 32>}, {pipeline_mode = #tpu.pipeline_mode<synchronous>, transform_indices = @transform_2, window_bounds = array<i64: 2, 8, 32>}, {pipeline_mode = #tpu.pipeline_mode<synchronous>, transform_indices = @transform_3, window_bounds = array<i64: 2, 8, 32>}, {pipeline_mode = #tpu.pipeline_mode<synchronous>, transform_indices = @transform_4, window_bounds = array<i64: 40, 128>}, {pipeline_mode = #tpu.pipeline_mode<synchronous>, transform_indices = @transform_5, window_bounds = array<i64: 2, 8, 32>}]} {
    %c0 = arith.constant 0 : index
    %c0_0 = arith.constant 0 : index
    %0 = vector.load %arg5[%c0, %c0_0] : memref<40x128xf32, #tpu.memory_space<vmem>>, vector<40x128xf32>
    %1 = vector.extract_strided_slice %0 {offsets = [0, 0], sizes = [32, 32], strides = [1, 1]} : vector<40x128xf32> to vector<32x32xf32>
    %2 = vector.extract_strided_slice %0 {offsets = [0, 96], sizes = [32, 32], strides = [1, 1]} : vector<40x128xf32> to vector<32x32xf32>
    %3 = vector.extract_strided_slice %0 {offsets = [32, 0], sizes = [1, 32], strides = [1, 1]} : vector<40x128xf32> to vector<1x32xf32>
    %4 = vector.extract_strided_slice %0 {offsets = [32, 96], sizes = [1, 32], strides = [1, 1]} : vector<40x128xf32> to vector<1x32xf32>
    %5 = vector.extract_strided_slice %0 {offsets = [33, 0], sizes = [1, 32], strides = [1, 1]} : vector<40x128xf32> to vector<1x32xf32>
    %6 = vector.extract_strided_slice %0 {offsets = [33, 32], sizes = [1, 32], strides = [1, 1]} : vector<40x128xf32> to vector<1x32xf32>
    %c0_1 = arith.constant 0 : index
    %c0_2 = arith.constant 0 : index
    %c0_3 = arith.constant 0 : index
    %7 = vector.load %arg1[%c0_1, %c0_2, %c0_3] : memref<2x8x32xf32, #tpu.memory_space<vmem>>, vector<2x8x32xf32>
    %8 = vector.shape_cast %7 : vector<2x8x32xf32> to vector<16x32xf32>
    %c0_4 = arith.constant 0 : index
    %c0_5 = arith.constant 0 : index
    %c0_6 = arith.constant 0 : index
    %9 = vector.load %arg2[%c0_4, %c0_5, %c0_6] : memref<2x8x32xf32, #tpu.memory_space<vmem>>, vector<2x8x32xf32>
    %10 = vector.shape_cast %9 : vector<2x8x32xf32> to vector<16x32xf32>
    %c0_7 = arith.constant 0 : index
    %c0_8 = arith.constant 0 : index
    %c0_9 = arith.constant 0 : index
    %11 = vector.load %arg3[%c0_7, %c0_8, %c0_9] : memref<2x8x32xf32, #tpu.memory_space<vmem>>, vector<2x8x32xf32>
    %12 = vector.shape_cast %11 : vector<2x8x32xf32> to vector<16x32xf32>
    %cst = arith.constant dense<0.000000e+00> : vector<16x32xf32>
    %13 = tpu.matmul %10, %1, %cst {dimension_numbers = #tpu.dot_dimension_numbers<[1], [0], [0], [1], [0, 0, 1, 1], [], []>} : vector<16x32xf32>, vector<32x32xf32>, vector<16x32xf32> -> vector<16x32xf32>
    %14 = vector.broadcast %3 : vector<1x32xf32> to vector<16x32xf32>
    %15 = arith.addf %13, %14 : vector<16x32xf32>
    %c0_10 = arith.constant 0 : index
    %c0_11 = arith.constant 0 : index
    %c0_12 = arith.constant 0 : index
    %16 = vector.load %arg4[%c0_10, %c0_11, %c0_12] : memref<2x8x32xf32, #tpu.memory_space<vmem>>, vector<2x8x32xf32>
    %17 = vector.shape_cast %16 : vector<2x8x32xf32> to vector<16x32xf32>
    %18 = vector.extract_strided_slice %0 {offsets = [0, 32], sizes = [32, 32], strides = [1, 1]} : vector<40x128xf32> to vector<32x32xf32>
    %19 = vector.extract_strided_slice %0 {offsets = [0, 64], sizes = [32, 32], strides = [1, 1]} : vector<40x128xf32> to vector<32x32xf32>
    %20 = vector.extract_strided_slice %0 {offsets = [32, 32], sizes = [1, 32], strides = [1, 1]} : vector<40x128xf32> to vector<1x32xf32>
    %21 = vector.extract_strided_slice %0 {offsets = [32, 64], sizes = [1, 32], strides = [1, 1]} : vector<40x128xf32> to vector<1x32xf32>
    %cst_13 = arith.constant dense<0.000000e+00> : vector<16x32xf32>
    %22 = tpu.matmul %17, %18, %cst_13 {dimension_numbers = #tpu.dot_dimension_numbers<[1], [0], [0], [1], [0, 0, 1, 1], [], []>} : vector<16x32xf32>, vector<32x32xf32>, vector<16x32xf32> -> vector<16x32xf32>
    %23 = vector.broadcast %20 : vector<1x32xf32> to vector<16x32xf32>
    %24 = arith.addf %22, %23 : vector<16x32xf32>
    %cst_14 = arith.constant dense<0.000000e+00> : vector<16x32xf32>
    %25 = tpu.matmul %12, %19, %cst_14 {dimension_numbers = #tpu.dot_dimension_numbers<[1], [0], [0], [1], [0, 0, 1, 1], [], []>} : vector<16x32xf32>, vector<32x32xf32>, vector<16x32xf32> -> vector<16x32xf32>
    %26 = vector.broadcast %21 : vector<1x32xf32> to vector<16x32xf32>
    %27 = arith.addf %25, %26 : vector<16x32xf32>
    %28 = vector.extract_strided_slice %15 {offsets = [0, 0], sizes = [8, 32], strides = [1, 1]} : vector<16x32xf32> to vector<8x32xf32>
    %29 = vector.extract_strided_slice %24 {offsets = [0, 0], sizes = [8, 32], strides = [1, 1]} : vector<16x32xf32> to vector<8x32xf32>
    %30 = vector.extract_strided_slice %27 {offsets = [0, 0], sizes = [8, 32], strides = [1, 1]} : vector<16x32xf32> to vector<8x32xf32>
    %31 = vector.extract_strided_slice %28 {offsets = [0, 0], sizes = [8, 8], strides = [1, 1]} : vector<8x32xf32> to vector<8x8xf32>
    %32 = vector.extract_strided_slice %29 {offsets = [0, 0], sizes = [8, 8], strides = [1, 1]} : vector<8x32xf32> to vector<8x8xf32>
    "tpu.trace_start"() <{level = 10 : i32, message = "qd,kd->qk"}> : () -> ()
    %cst_15 = arith.constant dense<0.000000e+00> : vector<8x8xf32>
    %33 = tpu.matmul %31, %32, %cst_15 {dimension_numbers = #tpu.dot_dimension_numbers<[1], [1], [0], [0], [0, 0, 1, 0], [], []>} : vector<8x8xf32>, vector<8x8xf32>, vector<8x8xf32> -> vector<8x8xf32>
    "tpu.trace_stop"() : () -> ()
    %cst_16 = arith.constant dense<0xFF800000> : vector<8xf32>
    %34 = vector.multi_reduction <maximumf>, %33, %cst_16 [1] : vector<8x8xf32> to vector<8xf32>
    %35 = vector.shape_cast %34 : vector<8xf32> to vector<8x1xf32>
    %36 = vector.broadcast %35 : vector<8x1xf32> to vector<8x8xf32>
    %37 = arith.subf %33, %36 : vector<8x8xf32>
    %38 = math.exp %37 : vector<8x8xf32>
    %cst_17 = arith.constant dense<0.000000e+00> : vector<8xf32>
    %39 = vector.multi_reduction <add>, %38, %cst_17 [1] : vector<8x8xf32> to vector<8xf32>
    %40 = vector.shape_cast %39 : vector<8xf32> to vector<8x1xf32>
    %41 = tpu.reciprocal %40 {approx = true} : vector<8x1xf32> -> vector<8x1xf32>
    %42 = arith.mulf %40, %41 : vector<8x1xf32>
    %cst_18 = arith.constant 2.000000e+00 : f32
    %43 = vector.broadcast %cst_18 : f32 to vector<8x1xf32>
    %44 = arith.subf %43, %42 : vector<8x1xf32>
    %45 = arith.mulf %41, %44 : vector<8x1xf32>
    %46 = vector.broadcast %45 : vector<8x1xf32> to vector<8x8xf32>
    %47 = arith.mulf %38, %46 : vector<8x8xf32>
    %48 = vector.extract_strided_slice %30 {offsets = [0, 0], sizes = [8, 8], strides = [1, 1]} : vector<8x32xf32> to vector<8x8xf32>
    %cst_19 = arith.constant dense<0.000000e+00> : vector<8x8xf32>
    %49 = tpu.matmul %47, %48, %cst_19 {dimension_numbers = #tpu.dot_dimension_numbers<[1], [0], [0], [1], [0, 0, 1, 1], [], []>} : vector<8x8xf32>, vector<8x8xf32>, vector<8x8xf32> -> vector<8x8xf32>
    %50 = vector.extract_strided_slice %28 {offsets = [0, 8], sizes = [8, 8], strides = [1, 1]} : vector<8x32xf32> to vector<8x8xf32>
    %51 = vector.extract_strided_slice %29 {offsets = [0, 8], sizes = [8, 8], strides = [1, 1]} : vector<8x32xf32> to vector<8x8xf32>
    "tpu.trace_start"() <{level = 10 : i32, message = "qd,kd->qk"}> : () -> ()
    %cst_20 = arith.constant dense<0.000000e+00> : vector<8x8xf32>
    %52 = tpu.matmul %50, %51, %cst_20 {dimension_numbers = #tpu.dot_dimension_numbers<[1], [1], [0], [0], [0, 0, 1, 0], [], []>} : vector<8x8xf32>, vector<8x8xf32>, vector<8x8xf32> -> vector<8x8xf32>
    "tpu.trace_stop"() : () -> ()
    %cst_21 = arith.constant dense<0xFF800000> : vector<8xf32>
    %53 = vector.multi_reduction <maximumf>, %52, %cst_21 [1] : vector<8x8xf32> to vector<8xf32>
    %54 = vector.shape_cast %53 : vector<8xf32> to vector<8x1xf32>
    %55 = vector.broadcast %54 : vector<8x1xf32> to vector<8x8xf32>
    %56 = arith.subf %52, %55 : vector<8x8xf32>
    %57 = math.exp %56 : vector<8x8xf32>
    %cst_22 = arith.constant dense<0.000000e+00> : vector<8xf32>
    %58 = vector.multi_reduction <add>, %57, %cst_22 [1] : vector<8x8xf32> to vector<8xf32>
    %59 = vector.shape_cast %58 : vector<8xf32> to vector<8x1xf32>
    %60 = tpu.reciprocal %59 {approx = true} : vector<8x1xf32> -> vector<8x1xf32>
    %61 = arith.mulf %59, %60 : vector<8x1xf32>
    %cst_23 = arith.constant 2.000000e+00 : f32
    %62 = vector.broadcast %cst_23 : f32 to vector<8x1xf32>
    %63 = arith.subf %62, %61 : vector<8x1xf32>
    %64 = arith.mulf %60, %63 : vector<8x1xf32>
    %65 = vector.broadcast %64 : vector<8x1xf32> to vector<8x8xf32>
    %66 = arith.mulf %57, %65 : vector<8x8xf32>
    %67 = vector.extract_strided_slice %30 {offsets = [0, 8], sizes = [8, 8], strides = [1, 1]} : vector<8x32xf32> to vector<8x8xf32>
    %cst_24 = arith.constant dense<0.000000e+00> : vector<8x8xf32>
    %68 = tpu.matmul %66, %67, %cst_24 {dimension_numbers = #tpu.dot_dimension_numbers<[1], [0], [0], [1], [0, 0, 1, 1], [], []>} : vector<8x8xf32>, vector<8x8xf32>, vector<8x8xf32> -> vector<8x8xf32>
    %69 = vector.extract_strided_slice %28 {offsets = [0, 16], sizes = [8, 8], strides = [1, 1]} : vector<8x32xf32> to vector<8x8xf32>
    %70 = vector.extract_strided_slice %29 {offsets = [0, 16], sizes = [8, 8], strides = [1, 1]} : vector<8x32xf32> to vector<8x8xf32>
    "tpu.trace_start"() <{level = 10 : i32, message = "qd,kd->qk"}> : () -> ()
    %cst_25 = arith.constant dense<0.000000e+00> : vector<8x8xf32>
    %71 = tpu.matmul %69, %70, %cst_25 {dimension_numbers = #tpu.dot_dimension_numbers<[1], [1], [0], [0], [0, 0, 1, 0], [], []>} : vector<8x8xf32>, vector<8x8xf32>, vector<8x8xf32> -> vector<8x8xf32>
    "tpu.trace_stop"() : () -> ()
    %cst_26 = arith.constant dense<0xFF800000> : vector<8xf32>
    %72 = vector.multi_reduction <maximumf>, %71, %cst_26 [1] : vector<8x8xf32> to vector<8xf32>
    %73 = vector.shape_cast %72 : vector<8xf32> to vector<8x1xf32>
    %74 = vector.broadcast %73 : vector<8x1xf32> to vector<8x8xf32>
    %75 = arith.subf %71, %74 : vector<8x8xf32>
    %76 = math.exp %75 : vector<8x8xf32>
    %cst_27 = arith.constant dense<0.000000e+00> : vector<8xf32>
    %77 = vector.multi_reduction <add>, %76, %cst_27 [1] : vector<8x8xf32> to vector<8xf32>
    %78 = vector.shape_cast %77 : vector<8xf32> to vector<8x1xf32>
    %79 = tpu.reciprocal %78 {approx = true} : vector<8x1xf32> -> vector<8x1xf32>
    %80 = arith.mulf %78, %79 : vector<8x1xf32>
    %cst_28 = arith.constant 2.000000e+00 : f32
    %81 = vector.broadcast %cst_28 : f32 to vector<8x1xf32>
    %82 = arith.subf %81, %80 : vector<8x1xf32>
    %83 = arith.mulf %79, %82 : vector<8x1xf32>
    %84 = vector.broadcast %83 : vector<8x1xf32> to vector<8x8xf32>
    %85 = arith.mulf %76, %84 : vector<8x8xf32>
    %86 = vector.extract_strided_slice %30 {offsets = [0, 16], sizes = [8, 8], strides = [1, 1]} : vector<8x32xf32> to vector<8x8xf32>
    %cst_29 = arith.constant dense<0.000000e+00> : vector<8x8xf32>
    %87 = tpu.matmul %85, %86, %cst_29 {dimension_numbers = #tpu.dot_dimension_numbers<[1], [0], [0], [1], [0, 0, 1, 1], [], []>} : vector<8x8xf32>, vector<8x8xf32>, vector<8x8xf32> -> vector<8x8xf32>
    %88 = vector.extract_strided_slice %28 {offsets = [0, 24], sizes = [8, 8], strides = [1, 1]} : vector<8x32xf32> to vector<8x8xf32>
    %89 = vector.extract_strided_slice %29 {offsets = [0, 24], sizes = [8, 8], strides = [1, 1]} : vector<8x32xf32> to vector<8x8xf32>
    "tpu.trace_start"() <{level = 10 : i32, message = "qd,kd->qk"}> : () -> ()
    %cst_30 = arith.constant dense<0.000000e+00> : vector<8x8xf32>
    %90 = tpu.matmul %88, %89, %cst_30 {dimension_numbers = #tpu.dot_dimension_numbers<[1], [1], [0], [0], [0, 0, 1, 0], [], []>} : vector<8x8xf32>, vector<8x8xf32>, vector<8x8xf32> -> vector<8x8xf32>
    "tpu.trace_stop"() : () -> ()
    %cst_31 = arith.constant dense<0xFF800000> : vector<8xf32>
    %91 = vector.multi_reduction <maximumf>, %90, %cst_31 [1] : vector<8x8xf32> to vector<8xf32>
    %92 = vector.shape_cast %91 : vector<8xf32> to vector<8x1xf32>
    %93 = vector.broadcast %92 : vector<8x1xf32> to vector<8x8xf32>
    %94 = arith.subf %90, %93 : vector<8x8xf32>
    %95 = math.exp %94 : vector<8x8xf32>
    %cst_32 = arith.constant dense<0.000000e+00> : vector<8xf32>
    %96 = vector.multi_reduction <add>, %95, %cst_32 [1] : vector<8x8xf32> to vector<8xf32>
    %97 = vector.shape_cast %96 : vector<8xf32> to vector<8x1xf32>
    %98 = tpu.reciprocal %97 {approx = true} : vector<8x1xf32> -> vector<8x1xf32>
    %99 = arith.mulf %97, %98 : vector<8x1xf32>
    %cst_33 = arith.constant 2.000000e+00 : f32
    %100 = vector.broadcast %cst_33 : f32 to vector<8x1xf32>
    %101 = arith.subf %100, %99 : vector<8x1xf32>
    %102 = arith.mulf %98, %101 : vector<8x1xf32>
    %103 = vector.broadcast %102 : vector<8x1xf32> to vector<8x8xf32>
    %104 = arith.mulf %95, %103 : vector<8x8xf32>
    %105 = vector.extract_strided_slice %30 {offsets = [0, 24], sizes = [8, 8], strides = [1, 1]} : vector<8x32xf32> to vector<8x8xf32>
    %cst_34 = arith.constant dense<0.000000e+00> : vector<8x8xf32>
    %106 = tpu.matmul %104, %105, %cst_34 {dimension_numbers = #tpu.dot_dimension_numbers<[1], [0], [0], [1], [0, 0, 1, 1], [], []>} : vector<8x8xf32>, vector<8x8xf32>, vector<8x8xf32> -> vector<8x8xf32>
    %107 = tpu.concatenate %49, %68, %87, %106 in 1 : vector<8x8xf32>, vector<8x8xf32>, vector<8x8xf32>, vector<8x8xf32> -> vector<8x32xf32>
    %108 = vector.extract_strided_slice %15 {offsets = [8, 0], sizes = [8, 32], strides = [1, 1]} : vector<16x32xf32> to vector<8x32xf32>
    %109 = vector.extract_strided_slice %24 {offsets = [8, 0], sizes = [8, 32], strides = [1, 1]} : vector<16x32xf32> to vector<8x32xf32>
    %110 = vector.extract_strided_slice %27 {offsets = [8, 0], sizes = [8, 32], strides = [1, 1]} : vector<16x32xf32> to vector<8x32xf32>
    %111 = vector.extract_strided_slice %108 {offsets = [0, 0], sizes = [8, 8], strides = [1, 1]} : vector<8x32xf32> to vector<8x8xf32>
    %112 = vector.extract_strided_slice %109 {offsets = [0, 0], sizes = [8, 8], strides = [1, 1]} : vector<8x32xf32> to vector<8x8xf32>
    "tpu.trace_start"() <{level = 10 : i32, message = "qd,kd->qk"}> : () -> ()
    %cst_35 = arith.constant dense<0.000000e+00> : vector<8x8xf32>
    %113 = tpu.matmul %111, %112, %cst_35 {dimension_numbers = #tpu.dot_dimension_numbers<[1], [1], [0], [0], [0, 0, 1, 0], [], []>} : vector<8x8xf32>, vector<8x8xf32>, vector<8x8xf32> -> vector<8x8xf32>
    "tpu.trace_stop"() : () -> ()
    %cst_36 = arith.constant dense<0xFF800000> : vector<8xf32>
    %114 = vector.multi_reduction <maximumf>, %113, %cst_36 [1] : vector<8x8xf32> to vector<8xf32>
    %115 = vector.shape_cast %114 : vector<8xf32> to vector<8x1xf32>
    %116 = vector.broadcast %115 : vector<8x1xf32> to vector<8x8xf32>
    %117 = arith.subf %113, %116 : vector<8x8xf32>
    %118 = math.exp %117 : vector<8x8xf32>
    %cst_37 = arith.constant dense<0.000000e+00> : vector<8xf32>
    %119 = vector.multi_reduction <add>, %118, %cst_37 [1] : vector<8x8xf32> to vector<8xf32>
    %120 = vector.shape_cast %119 : vector<8xf32> to vector<8x1xf32>
    %121 = tpu.reciprocal %120 {approx = true} : vector<8x1xf32> -> vector<8x1xf32>
    %122 = arith.mulf %120, %121 : vector<8x1xf32>
    %cst_38 = arith.constant 2.000000e+00 : f32
    %123 = vector.broadcast %cst_38 : f32 to vector<8x1xf32>
    %124 = arith.subf %123, %122 : vector<8x1xf32>
    %125 = arith.mulf %121, %124 : vector<8x1xf32>
    %126 = vector.broadcast %125 : vector<8x1xf32> to vector<8x8xf32>
    %127 = arith.mulf %118, %126 : vector<8x8xf32>
    %128 = vector.extract_strided_slice %110 {offsets = [0, 0], sizes = [8, 8], strides = [1, 1]} : vector<8x32xf32> to vector<8x8xf32>
    %cst_39 = arith.constant dense<0.000000e+00> : vector<8x8xf32>
    %129 = tpu.matmul %127, %128, %cst_39 {dimension_numbers = #tpu.dot_dimension_numbers<[1], [0], [0], [1], [0, 0, 1, 1], [], []>} : vector<8x8xf32>, vector<8x8xf32>, vector<8x8xf32> -> vector<8x8xf32>
    %130 = vector.extract_strided_slice %108 {offsets = [0, 8], sizes = [8, 8], strides = [1, 1]} : vector<8x32xf32> to vector<8x8xf32>
    %131 = vector.extract_strided_slice %109 {offsets = [0, 8], sizes = [8, 8], strides = [1, 1]} : vector<8x32xf32> to vector<8x8xf32>
    "tpu.trace_start"() <{level = 10 : i32, message = "qd,kd->qk"}> : () -> ()
    %cst_40 = arith.constant dense<0.000000e+00> : vector<8x8xf32>
    %132 = tpu.matmul %130, %131, %cst_40 {dimension_numbers = #tpu.dot_dimension_numbers<[1], [1], [0], [0], [0, 0, 1, 0], [], []>} : vector<8x8xf32>, vector<8x8xf32>, vector<8x8xf32> -> vector<8x8xf32>
    "tpu.trace_stop"() : () -> ()
    %cst_41 = arith.constant dense<0xFF800000> : vector<8xf32>
    %133 = vector.multi_reduction <maximumf>, %132, %cst_41 [1] : vector<8x8xf32> to vector<8xf32>
    %134 = vector.shape_cast %133 : vector<8xf32> to vector<8x1xf32>
    %135 = vector.broadcast %134 : vector<8x1xf32> to vector<8x8xf32>
    %136 = arith.subf %132, %135 : vector<8x8xf32>
    %137 = math.exp %136 : vector<8x8xf32>
    %cst_42 = arith.constant dense<0.000000e+00> : vector<8xf32>
    %138 = vector.multi_reduction <add>, %137, %cst_42 [1] : vector<8x8xf32> to vector<8xf32>
    %139 = vector.shape_cast %138 : vector<8xf32> to vector<8x1xf32>
    %140 = tpu.reciprocal %139 {approx = true} : vector<8x1xf32> -> vector<8x1xf32>
    %141 = arith.mulf %139, %140 : vector<8x1xf32>
    %cst_43 = arith.constant 2.000000e+00 : f32
    %142 = vector.broadcast %cst_43 : f32 to vector<8x1xf32>
    %143 = arith.subf %142, %141 : vector<8x1xf32>
    %144 = arith.mulf %140, %143 : vector<8x1xf32>
    %145 = vector.broadcast %144 : vector<8x1xf32> to vector<8x8xf32>
    %146 = arith.mulf %137, %145 : vector<8x8xf32>
    %147 = vector.extract_strided_slice %110 {offsets = [0, 8], sizes = [8, 8], strides = [1, 1]} : vector<8x32xf32> to vector<8x8xf32>
    %cst_44 = arith.constant dense<0.000000e+00> : vector<8x8xf32>
    %148 = tpu.matmul %146, %147, %cst_44 {dimension_numbers = #tpu.dot_dimension_numbers<[1], [0], [0], [1], [0, 0, 1, 1], [], []>} : vector<8x8xf32>, vector<8x8xf32>, vector<8x8xf32> -> vector<8x8xf32>
    %149 = vector.extract_strided_slice %108 {offsets = [0, 16], sizes = [8, 8], strides = [1, 1]} : vector<8x32xf32> to vector<8x8xf32>
    %150 = vector.extract_strided_slice %109 {offsets = [0, 16], sizes = [8, 8], strides = [1, 1]} : vector<8x32xf32> to vector<8x8xf32>
    "tpu.trace_start"() <{level = 10 : i32, message = "qd,kd->qk"}> : () -> ()
    %cst_45 = arith.constant dense<0.000000e+00> : vector<8x8xf32>
    %151 = tpu.matmul %149, %150, %cst_45 {dimension_numbers = #tpu.dot_dimension_numbers<[1], [1], [0], [0], [0, 0, 1, 0], [], []>} : vector<8x8xf32>, vector<8x8xf32>, vector<8x8xf32> -> vector<8x8xf32>
    "tpu.trace_stop"() : () -> ()
    %cst_46 = arith.constant dense<0xFF800000> : vector<8xf32>
    %152 = vector.multi_reduction <maximumf>, %151, %cst_46 [1] : vector<8x8xf32> to vector<8xf32>
    %153 = vector.shape_cast %152 : vector<8xf32> to vector<8x1xf32>
    %154 = vector.broadcast %153 : vector<8x1xf32> to vector<8x8xf32>
    %155 = arith.subf %151, %154 : vector<8x8xf32>
    %156 = math.exp %155 : vector<8x8xf32>
    %cst_47 = arith.constant dense<0.000000e+00> : vector<8xf32>
    %157 = vector.multi_reduction <add>, %156, %cst_47 [1] : vector<8x8xf32> to vector<8xf32>
    %158 = vector.shape_cast %157 : vector<8xf32> to vector<8x1xf32>
    %159 = tpu.reciprocal %158 {approx = true} : vector<8x1xf32> -> vector<8x1xf32>
    %160 = arith.mulf %158, %159 : vector<8x1xf32>
    %cst_48 = arith.constant 2.000000e+00 : f32
    %161 = vector.broadcast %cst_48 : f32 to vector<8x1xf32>
    %162 = arith.subf %161, %160 : vector<8x1xf32>
    %163 = arith.mulf %159, %162 : vector<8x1xf32>
    %164 = vector.broadcast %163 : vector<8x1xf32> to vector<8x8xf32>
    %165 = arith.mulf %156, %164 : vector<8x8xf32>
    %166 = vector.extract_strided_slice %110 {offsets = [0, 16], sizes = [8, 8], strides = [1, 1]} : vector<8x32xf32> to vector<8x8xf32>
    %cst_49 = arith.constant dense<0.000000e+00> : vector<8x8xf32>
    %167 = tpu.matmul %165, %166, %cst_49 {dimension_numbers = #tpu.dot_dimension_numbers<[1], [0], [0], [1], [0, 0, 1, 1], [], []>} : vector<8x8xf32>, vector<8x8xf32>, vector<8x8xf32> -> vector<8x8xf32>
    %168 = vector.extract_strided_slice %108 {offsets = [0, 24], sizes = [8, 8], strides = [1, 1]} : vector<8x32xf32> to vector<8x8xf32>
    %169 = vector.extract_strided_slice %109 {offsets = [0, 24], sizes = [8, 8], strides = [1, 1]} : vector<8x32xf32> to vector<8x8xf32>
    "tpu.trace_start"() <{level = 10 : i32, message = "qd,kd->qk"}> : () -> ()
    %cst_50 = arith.constant dense<0.000000e+00> : vector<8x8xf32>
    %170 = tpu.matmul %168, %169, %cst_50 {dimension_numbers = #tpu.dot_dimension_numbers<[1], [1], [0], [0], [0, 0, 1, 0], [], []>} : vector<8x8xf32>, vector<8x8xf32>, vector<8x8xf32> -> vector<8x8xf32>
    "tpu.trace_stop"() : () -> ()
    %cst_51 = arith.constant dense<0xFF800000> : vector<8xf32>
    %171 = vector.multi_reduction <maximumf>, %170, %cst_51 [1] : vector<8x8xf32> to vector<8xf32>
    %172 = vector.shape_cast %171 : vector<8xf32> to vector<8x1xf32>
    %173 = vector.broadcast %172 : vector<8x1xf32> to vector<8x8xf32>
    %174 = arith.subf %170, %173 : vector<8x8xf32>
    %175 = math.exp %174 : vector<8x8xf32>
    %cst_52 = arith.constant dense<0.000000e+00> : vector<8xf32>
    %176 = vector.multi_reduction <add>, %175, %cst_52 [1] : vector<8x8xf32> to vector<8xf32>
    %177 = vector.shape_cast %176 : vector<8xf32> to vector<8x1xf32>
    %178 = tpu.reciprocal %177 {approx = true} : vector<8x1xf32> -> vector<8x1xf32>
    %179 = arith.mulf %177, %178 : vector<8x1xf32>
    %cst_53 = arith.constant 2.000000e+00 : f32
    %180 = vector.broadcast %cst_53 : f32 to vector<8x1xf32>
    %181 = arith.subf %180, %179 : vector<8x1xf32>
    %182 = arith.mulf %178, %181 : vector<8x1xf32>
    %183 = vector.broadcast %182 : vector<8x1xf32> to vector<8x8xf32>
    %184 = arith.mulf %175, %183 : vector<8x8xf32>
    %185 = vector.extract_strided_slice %110 {offsets = [0, 24], sizes = [8, 8], strides = [1, 1]} : vector<8x32xf32> to vector<8x8xf32>
    %cst_54 = arith.constant dense<0.000000e+00> : vector<8x8xf32>
    %186 = tpu.matmul %184, %185, %cst_54 {dimension_numbers = #tpu.dot_dimension_numbers<[1], [0], [0], [1], [0, 0, 1, 1], [], []>} : vector<8x8xf32>, vector<8x8xf32>, vector<8x8xf32> -> vector<8x8xf32>
    %187 = tpu.concatenate %129, %148, %167, %186 in 1 : vector<8x8xf32>, vector<8x8xf32>, vector<8x8xf32>, vector<8x8xf32> -> vector<8x32xf32>
    %188 = tpu.concatenate %107, %187 in 0 : vector<8x32xf32>, vector<8x32xf32> -> vector<16x32xf32>
    %cst_55 = arith.constant dense<0.000000e+00> : vector<16x32xf32>
    %189 = tpu.matmul %188, %2, %cst_55 {dimension_numbers = #tpu.dot_dimension_numbers<[1], [0], [0], [1], [0, 0, 1, 1], [], []>} : vector<16x32xf32>, vector<32x32xf32>, vector<16x32xf32> -> vector<16x32xf32>
    %190 = vector.broadcast %4 : vector<1x32xf32> to vector<16x32xf32>
    %191 = arith.addf %189, %190 : vector<16x32xf32>
    %192 = arith.addf %8, %191 : vector<16x32xf32>
    %cst_56 = arith.constant dense<0.000000e+00> : vector<16xf32>
    %193 = vector.multi_reduction <add>, %192, %cst_56 [1] : vector<16x32xf32> to vector<16xf32>
    %194 = vector.shape_cast %193 : vector<16xf32> to vector<16x1xf32>
    %cst_57 = arith.constant 3.200000e+01 : f32
    %195 = vector.broadcast %cst_57 : f32 to vector<16x1xf32>
    %196 = arith.divf %194, %195 : vector<16x1xf32>
    %197 = vector.broadcast %196 : vector<16x1xf32> to vector<16x32xf32>
    %198 = arith.subf %192, %197 : vector<16x32xf32>
    %199 = arith.mulf %198, %198 : vector<16x32xf32>
    %cst_58 = arith.constant dense<0.000000e+00> : vector<16xf32>
    %200 = vector.multi_reduction <add>, %199, %cst_58 [1] : vector<16x32xf32> to vector<16xf32>
    %201 = vector.shape_cast %200 : vector<16xf32> to vector<16x1xf32>
    %cst_59 = arith.constant 3.200000e+01 : f32
    %202 = vector.broadcast %cst_59 : f32 to vector<16x1xf32>
    %203 = arith.divf %201, %202 : vector<16x1xf32>
    %204 = vector.broadcast %196 : vector<16x1xf32> to vector<16x32xf32>
    %205 = arith.subf %192, %204 : vector<16x32xf32>
    %cst_60 = arith.constant 9.99999974E-6 : f32
    %206 = vector.broadcast %cst_60 : f32 to vector<16x1xf32>
    %207 = arith.addf %203, %206 : vector<16x1xf32>
    %208 = math.rsqrt %207 : vector<16x1xf32>
    %209 = vector.broadcast %208 : vector<16x1xf32> to vector<16x32xf32>
    %210 = arith.mulf %205, %209 : vector<16x32xf32>
    %211 = vector.broadcast %5 : vector<1x32xf32> to vector<16x32xf32>
    %212 = arith.mulf %210, %211 : vector<16x32xf32>
    %213 = vector.broadcast %6 : vector<1x32xf32> to vector<16x32xf32>
    %214 = arith.addf %212, %213 : vector<16x32xf32>
    %215 = vector.shape_cast %214 : vector<16x32xf32> to vector<2x8x32xf32>
    %c0_61 = arith.constant 0 : index
    %c0_62 = arith.constant 0 : index
    %c0_63 = arith.constant 0 : index
    %216 = vector.load %arg6[%c0_61, %c0_62, %c0_63] : memref<2x8x32xf32, #tpu.memory_space<vmem>>, vector<2x8x32xf32>
    tpu.vector_store %arg6[%c0_61, %c0_62, %c0_63], %215 {strides = array<i32>} : memref<2x8x32xf32, #tpu.memory_space<vmem>>, vector<2x8x32xf32>,
    return
  }
  func.func @transform_0(%arg0: i32) -> (i32, i32, i32) {
    %c0_i32 = arith.constant 0 : i32
    %c0_i32_0 = arith.constant 0 : i32
    %c0_i32_1 = arith.constant 0 : i32
    %c0_i32_2 = arith.constant 0 : i32
    return %c0_i32, %c0_i32_0, %c0_i32_1 : i32, i32, i32
  }
  func.func @transform_1(%arg0: i32) -> (i32, i32, i32) {
    %c0_i32 = arith.constant 0 : i32
    %c0_i32_0 = arith.constant 0 : i32
    %c0_i32_1 = arith.constant 0 : i32
    %c0_i32_2 = arith.constant 0 : i32
    return %c0_i32, %c0_i32_0, %c0_i32_1 : i32, i32, i32
  }
  func.func @transform_2(%arg0: i32) -> (i32, i32, i32) {
    %c0_i32 = arith.constant 0 : i32
    %c0_i32_0 = arith.constant 0 : i32
    %c0_i32_1 = arith.constant 0 : i32
    %c0_i32_2 = arith.constant 0 : i32
    return %c0_i32, %c0_i32_0, %c0_i32_1 : i32, i32, i32
  }
  func.func @transform_3(%arg0: i32) -> (i32, i32, i32) {
    %c0_i32 = arith.constant 0 : i32
    %c0_i32_0 = arith.constant 0 : i32
    %c0_i32_1 = arith.constant 0 : i32
    %c0_i32_2 = arith.constant 0 : i32
    return %c0_i32, %c0_i32_0, %c0_i32_1 : i32, i32, i32
  }
  func.func @transform_4(%arg0: i32) -> (i32, i32) {
    %c0_i32 = arith.constant 0 : i32
    %c0_i32_0 = arith.constant 0 : i32
    %c0_i32_1 = arith.constant 0 : i32
    return %c0_i32, %c0_i32_0 : i32, i32
  }
  func.func @transform_5(%arg0: i32) -> (i32, i32, i32) {
    %c0_i32 = arith.constant 0 : i32
    %c0_i32_0 = arith.constant 0 : i32
    %c0_i32_1 = arith.constant 0 : i32
    %c0_i32_2 = arith.constant 0 : i32
    return %c0_i32, %c0_i32_0, %c0_i32_1 : i32, i32, i32
  }
}

</mosaic_0001>

<bundles_post_ra>
// kernel: tpu_custom_call.1
= control target key start
LH: loop header
LB: loop body
LE: loop exit
PB: predicated region body
PF: predicated region fallthrough
CT: control target
= control target key end

     0   :  { %10 = vsyncpa [#allocation3], 0  ;;  %s2730_s0 = inlined_call_operand.hbm [shape: f32[2,8,32], index: 0, kind: input, shape index: {}]   ;;  %s2731_s1 = inlined_call_operand.hbm [shape: f32[2,8,32], index: 1, kind: input, shape index: {}]   ;;  %s2732_s2 = inlined_call_operand.hbm [shape: f32[2,8,32], index: 2, kind: input, shape index: {}]   ;;  %s2733_s3 = inlined_call_operand.hbm [shape: f32[2,8,32], index: 3, kind: input, shape index: {}]   ;;  %s2734_s4 = inlined_call_operand.hbm [shape: f32[40,128], index: 4, kind: input, shape index: {}]   ;;  %s2735_s5 = inlined_call_operand.hbm [shape: f32[2,8,32], index: 5, kind: output, shape index: {}]  }
   0x1   :  { %11 = vsyncpa [#allocation6], 0 }
   0x2   :  { %12 = vsyncpa [#allocation9], 0 }
   0x3   :  { %13 = vsyncpa [#allocation4], 0  ;;  %s2380_s18 = smov [#allocation5]   ;;  %s2381_s20 = smov [#allocation8]  }
   0x4   :  { %s31_s19 = sshll.u32 %s2380_s18, 4  ;;  %s55_s21 = sshll.u32 %s2381_s20, 4  ;;  %s32_s19 = int_to_ptr.vmem [resolvable:$true] %s31_s19  ;;  %s2428_s21 = int_to_ptr.vmem [resolvable:$true] %s55_s21 }
   0x5   :  { %s2240_s24 = scalar_lea.hbm %s2731_s1, 256 }
   0x6   :  { %p2241_p0 = scmp.ne.s32.totalorder %s2731_s1, %s2240_s24  ;;  %p2244_p1 = scmp.lt.u32.totalorder %s2240_s24, %s2731_s1 }
   0x8   :  { %p2246_p2 = pnand %p2244_p1, %p2241_p0 }
   0xa   :  { %2249 = shalt.err (!%p2246_p2)
}
   0xb   :  { %s2250_s29 = scalar_lea.vmem %s32_s19, 256  ;;  %p2255_p4 = scmp.lt.s32.totalorder %s32_s19, %s32_s19 }
   0xc   :  { %p2251_p3 = scmp.ne.s32.totalorder %s32_s19, %s2250_s29  ;;  %p2256_p5 = scmp.lt.s32.totalorder %s2250_s29, %s2250_s29 }
   0xe   :  { %p2257_p6 = por %p2256_p5, %p2255_p4 }
  0x10   :  { %p2258_p7 = pnand %p2257_p6, %p2251_p3 }
  0x12   :  { %2261 = shalt.err (!%p2258_p7)
}
  0x13   :  { %s2382_s30 = smov 128   ;;  %s2383_s6 = smov 8  }
  0x14   :  { %37 = dma.hbm_to_vmem [thread:$0]  %s2731_s1, 256, %s32_s19, [#allocation6], %s2382_s30, %s2382_s30, %s2383_s6  }
  0x15   :  { %s2262_s11 = scalar_lea.hbm %s2733_s3, 256 }
  0x16   :  { %p2263_p8 = scmp.ne.s32.totalorder %s2733_s3, %s2262_s11  ;;  %p2266_p9 = scmp.lt.u32.totalorder %s2262_s11, %s2733_s3 }
  0x18   :  { %p2268_p10 = pnand %p2266_p9, %p2263_p8 }
  0x1a   :  { %2271 = shalt.err (!%p2268_p10)
}
  0x1b   :  { %s2272_s16 = scalar_lea.vmem %s2428_s21, 256  ;;  %p2277_p12 = scmp.lt.s32.totalorder %s2428_s21, %s2428_s21 }
  0x1c   :  { %p2273_p11 = scmp.ne.s32.totalorder %s2428_s21, %s2272_s16  ;;  %p2278_p13 = scmp.lt.s32.totalorder %s2272_s16, %s2272_s16 }
  0x1e   :  { %p2279_p0 = por %p2278_p13, %p2277_p12 }
  0x20   :  { %p2280_p1 = pnand %p2279_p0, %p2273_p11 }
  0x22   :  { %2283 = shalt.err (!%p2280_p1)
}
  0x23   :  { %61 = dma.hbm_to_vmem [thread:$0]  %s2733_s3, 256, %s2428_s21, [#allocation9], %s2382_s30, %s2382_s30, %s2383_s6  }
  0x24   :  { %s2384_s18 = smov [#allocation2]   ;;  %s2385_s20 = smov [#allocation7]  }
  0x25   :  { %s19_s19 = sshll.u32 %s2384_s18, 4  ;;  %s43_s22 = sshll.u32 %s2385_s20, 4  ;;  %s20_s19 = int_to_ptr.vmem [resolvable:$true] %s19_s19  ;;  %s2465_s22 = int_to_ptr.vmem [resolvable:$true] %s43_s22 }
  0x26   :  { %s2284_s25 = scalar_lea.hbm %s2730_s0, 256 }
  0x27   :  { %p2285_p2 = scmp.ne.s32.totalorder %s2730_s0, %s2284_s25  ;;  %p2288_p3 = scmp.lt.u32.totalorder %s2284_s25, %s2730_s0 }
  0x29   :  { %p2290_p4 = pnand %p2288_p3, %p2285_p2 }
  0x2b   :  { %2293 = shalt.err (!%p2290_p4)
}
  0x2c   :  { %s2294_s3 = scalar_lea.vmem %s20_s19, 256  ;;  %p2299_p6 = scmp.lt.s32.totalorder %s20_s19, %s20_s19 }
  0x2d   :  { %p2295_p5 = scmp.ne.s32.totalorder %s20_s19, %s2294_s3  ;;  %p2300_p7 = scmp.lt.s32.totalorder %s2294_s3, %s2294_s3 }
  0x2f   :  { %p2301_p8 = por %p2300_p7, %p2299_p6 }
  0x31   :  { %p2302_p9 = pnand %p2301_p8, %p2295_p5 }
  0x33   :  { %2305 = shalt.err (!%p2302_p9)
}
  0x34   :  { %25 = dma.hbm_to_vmem [thread:$0]  %s2730_s0, 256, %s20_s19, [#allocation3], %s2382_s30, %s2382_s30, %s2383_s6  }
  0x35   :  { %s2306_s10 = scalar_lea.hbm %s2732_s2, 256 }
  0x36   :  { %p2307_p10 = scmp.ne.s32.totalorder %s2732_s2, %s2306_s10  ;;  %p2310_p11 = scmp.lt.u32.totalorder %s2306_s10, %s2732_s2 }
  0x38   :  { %p2312_p12 = pnand %p2310_p11, %p2307_p10 }
  0x3a   :  { %2315 = shalt.err (!%p2312_p12)
}
  0x3b   :  { %s2316_s15 = scalar_lea.vmem %s2465_s22, 256  ;;  %p2321_p0 = scmp.lt.s32.totalorder %s2465_s22, %s2465_s22 }
  0x3c   :  { %p2317_p13 = scmp.ne.s32.totalorder %s2465_s22, %s2316_s15  ;;  %p2322_p1 = scmp.lt.s32.totalorder %s2316_s15, %s2316_s15 }
  0x3e   :  { %p2323_p2 = por %p2322_p1, %p2321_p0 }
  0x40   :  { %p2324_p3 = pnand %p2323_p2, %p2317_p13 }
  0x42   :  { %2327 = shalt.err (!%p2324_p3)
}
  0x43   :  { %49 = dma.hbm_to_vmem [thread:$0]  %s2732_s2, 256, %s2465_s22, [#allocation6], %s2382_s30, %s2382_s30, %s2383_s6  }
  0x44   :  { %s2386_s1 = smov [#allocation10]   ;;  %s2328_s20 = scalar_lea.hbm %s2734_s4, 640 }
  0x45   :  { %s67_s17 = sshll.u32 %s2386_s1, 4  ;;  %p2329_p4 = scmp.ne.s32.totalorder %s2734_s4, %s2328_s20  ;;  %s68_s17 = int_to_ptr.vmem [resolvable:$true] %s67_s17 }
  0x46   :  { %p2332_p5 = scmp.lt.u32.totalorder %s2328_s20, %s2734_s4 }
  0x48   :  { %p2334_p6 = pnand %p2332_p5, %p2329_p4 }
  0x4a   :  { %2337 = shalt.err (!%p2334_p6)
}
  0x4b   :  { %s2338_s27 = scalar_lea.vmem %s68_s17, 640  ;;  %p2343_p8 = scmp.lt.s32.totalorder %s68_s17, %s68_s17 }
  0x4c   :  { %p2339_p7 = scmp.ne.s32.totalorder %s68_s17, %s2338_s27  ;;  %p2344_p9 = scmp.lt.s32.totalorder %s2338_s27, %s2338_s27 }
  0x4e   :  { %p2345_p10 = por %p2344_p9, %p2343_p8 }
  0x50   :  { %p2346_p11 = pnand %p2345_p10, %p2339_p7 }
  0x52   :  { %2349 = shalt.err (!%p2346_p11)
}
  0x53   :  { %73 = dma.hbm_to_vmem [thread:$0]  %s2734_s4, 640, %s68_s17, [#allocation9], %s2382_s30, %s2382_s30, %s2383_s6  }
  0x54   :  { %2372 = dma.done.wait [#allocation3], 256  }
  0x55   :  { %2373 = vsyncadd [#allocation3], 4294967040 }
  0x56   :  { %2374 = dma.done.wait [#allocation6], 512  }
  0x57   :  { %2375 = vsyncadd [#allocation6], 4294966784 }
  0x58   :  { %2376 = dma.done.wait [#allocation9], 896  }
  0x59   :  { %2377 = vsyncadd [#allocation9], 4294966400  ;;  %vm104_vm0 = vcmask 261120   ;;  %v89_v0 = vld [vmem:[#allocation10] sm:$0xff]  ;;  %v90_v1 = vld [vmem:[#allocation10 + $0x8] sm:$0xff]  ;;  %v100_v9 = vlaneseq  ;;  %s2387_s4 = smov 96  }
  0x5a   :  { %v91_v2 = vld [vmem:[#allocation10 + $0x10] sm:$0xff]  ;;  %v2517_v3 = vpack.i.bf16 %v90_v1, %v89_v0  ;;  %v92_v4 = vld [vmem:[#allocation10 + $0x18] sm:$0xff]  ;;  %v2124_v5 = vpack.c.bf16 %v90_v1, %v89_v0  ;;  %v2527_v12 = vld [vmem:[#allocation10 + $0x20] sm:$0xff]  ;;  %v2388_v25 = vmov 0.0   ;;  %vm2389_vm1 = vmmov 0   ;;  %s2390_s28 = smov 64  }
  0x5b   :  { %v186_v6 = vld [vmem:[#allocation8] sm:$0xff]  ;;  %v2128_v7 = vpack.c.bf16 %v92_v4, %v91_v2  ;;  %v2522_v10 = vpack.i.bf16 %v92_v4, %v91_v2  ;;  %v2525_v11 = vshrl.u32 %v100_v9, 7  ;;  %v97_v14 = vld [vmem:[#allocation5 + $0x8] sm:$0xff]  ;;  %vm385_vm2 = vcmask 64512   ;;  %v98_v35 = vld [vmem:[#allocation7] sm:$0xff]  ;;  %s2391_s29 = smov 120  }
  0x5c   :  { %2019 = vmatprep.mubr.msk.f32.mxu1 %vm104_vm0, %v186_v6  ;;  %v96_v8 = vld [vmem:[#allocation5] sm:$0xff]  ;;  %2175 = vrot.lane.b32.xlu0 %v2517_v3, %s2387_s4  ;;  %v187_v24 = vld [vmem:[#allocation8 + $0x8] sm:$0xff]  ;;  %v99_v42 = vld [vmem:[#allocation7 + $0x8] sm:$0xff]  ;;  %s2392_s3 = smov 112   ;;  %s2393_s21 = smov 104   ;;  %vm1067_vm3 = vcmask 130048  }
  0x5d   :  { %2125 = vmatprep.subr.bf16.mxu0 %v2124_v5  ;;  %2008 = vmatprep.mubr.msk.f32.mxu0 %vm104_vm0, %v96_v8  ;;  %v102_v13 = vsub.s32 0, %v2525_v11  ;;  %s2394_s7 = smov 32   ;;  %s2395_s8 = smov 16   ;;  %vm1069_vm4 = vcmask 195584  }
  0x5e   :  { %2127 = vmatpush3.bf16.msra.mxu0 %v2124_v5  ;;  %s2396_s9 = smov 24   ;;  %s2397_s10 = smov [#allocation11]  }
  0x5f   :  { %2129 = vmatprep.subr.bf16.mxu0 %v2128_v7  ;;  %v2533_v15 = vrot.slane %v2527_v12, %v102_v13  ;;  %s1898_s11 = sshll.u32 %s2397_s10, 4  ;;  %s1899_s11 = int_to_ptr.vmem [resolvable:$true] %s1898_s11 }
  0x60   :  { %2180 = vrot.lane.b32.xlu0 %v2522_v10, %s2387_s4  ;;  %s2350_s12 = scalar_lea.vmem %s1899_s11, 256  ;;  %p2355_p13 = scmp.lt.s32.totalorder %s1899_s11, %s1899_s11 }
  0x61   :  { %205 = vrot.lane.b32.xlu1 %v2533_v15, %s2387_s4  ;;  %p2351_p12 = scmp.ne.s32.totalorder %s1899_s11, %s2350_s12  ;;  %p2356_p0 = scmp.lt.s32.totalorder %s2350_s12, %s2350_s12 }
  0x62   :  { %2131 = vmatpush3.bf16.msra.mxu0 %v2128_v7 }
  0x63   :  { %p2357_p1 = por %p2356_p0, %p2355_p13 }
  0x64   :  { %2190 = vrot.lane.b32.xlu0 %v2522_v10, %s2390_s28 }
  0x65   :  { %2009 = vmatmul.mubr.msk.f32.vlgmr.msra.gmra.mrb[0].mxu0 %vm104_vm0, %v97_v14  ;;  %2185 = vrot.lane.b32.xlu1 %v2517_v3, %s2390_s28  ;;  %p2358_p2 = pnand %p2357_p1, %p2351_p12 }
  0x66   :  { %2030 = vmatprep.mubr.msk.f32.mxu0 %vm104_vm0, %v98_v35 }
  0xce   :  { %v2176_v16 = vpop.permute.xlu0 %2175 }
  0xcf   :  { %v2178_v17 = vunpack.i.h.bf16 %v2176_v16  ;;  %v2177_v18 = vunpack.i.l.bf16 %v2176_v16 }
  0xd1   :  { %v2132_v19 = vpack.c.bf16 %v2178_v17, %v2177_v18 }
  0xd2   :  { %v2181_v20 = vpop.permute.xlu0 %2180 }
  0xd3   :  { %v2183_v21 = vunpack.i.h.bf16 %v2181_v20  ;;  %v2182_v22 = vunpack.i.l.bf16 %v2181_v20  ;;  %2133 = vmatprep.subr.bf16.mxu1 %v2132_v19  ;;  %v206_v28 = vpop.permute.xlu1 %205 }
  0xd4   :  { %2135 = vmatpush3.bf16.msra.mxu1 %v2132_v19 }
  0xd5   :  { %v2136_v23 = vpack.c.bf16 %v2183_v21, %v2182_v22 }
  0xd6   :  { %v2191_v34 = vpop.permute.xlu0 %2190 }
  0xd7   :  { %2137 = vmatprep.subr.bf16.mxu1 %v2136_v23  ;;  %v2186_v33 = vpop.permute.xlu1 %2185  ;;  %v2193_v38 = vunpack.i.h.bf16 %v2191_v34  ;;  %v2192_v39 = vunpack.i.l.bf16 %v2191_v34 }
  0xd8   :  { %2139 = vmatpush3.bf16.msra.mxu1 %v2136_v23  ;;  %v2188_v36 = vunpack.i.h.bf16 %v2186_v33  ;;  %v2187_v37 = vunpack.i.l.bf16 %v2186_v33 }
  0xd9   :  { %2033 = vmatprep.subr.mxu1 %v2388_v25  ;;  %v2144_v41 = vpack.c.bf16 %v2193_v38, %v2192_v39 }
  0xda   :  { %v2140_v40 = vpack.c.bf16 %v2188_v36, %v2187_v37 }
  0xdb   :  { %2020 = vmatmul.mubr.msk.f32.vlgmr.msra.gmra.mrb[0].mxu1 %vm104_vm0, %v187_v24 }
  0xdc   :  { %2035 = vmatprep.mubr.msk.f32.mxu1 %vm2389_vm1, %v2388_v25  ;;  %2141 = vmatprep.subr.bf16.mxu0 %v2140_v40 }
  0xdd   :  { %2143 = vmatpush3.bf16.msra.mxu0 %v2140_v40 }
  0xde   :  { %2145 = vmatprep.subr.bf16.mxu0 %v2144_v41 }
  0xe1   :  { %2147 = vmatpush3.bf16.msra.mxu0 %v2144_v41 }
  0xe2   :  { %2053 = vmatprep.subr.mxu0 %v2388_v25 }
  0xe4   :  { %2031 = vmatmul.mubr.msk.f32.vlgmr.msra.gmra.mrb[2].mxu0 %vm104_vm0, %v99_v42 }
  0xe5   :  { %2055 = vmatprep.mubr.msk.f32.mxu0 %vm2389_vm1, %v2388_v25 }
 0x138   :  { %v2010_v26 = vpop.f32.mrb[0].mxu0 }
 0x139   :  { %v177_v27 = vpop.f32.mrb[1].mxu0  ;;  %v183_v46 = vadd.f32 %v2010_v26, %v2533_v15 }
 0x13a   :  { %v178_v32 = vadd.f32 %v177_v27, %v2533_v15 }
 0x1ae   :  { %v2021_v29 = vpop.f32.mrb[0].mxu1 }
 0x1af   :  { %v280_v30 = vpop.f32.mrb[1].mxu1  ;;  %v286_v54 = vadd.f32 %v2021_v29, %v206_v28 }
 0x1b0   :  { %v281_v31 = vadd.f32 %v280_v30, %v206_v28 }
 0x1b2   :  { %2034 = vmatpush3.xpose.msk.msra.mxu1 %vm385_vm2, %v281_v31 }
 0x1b3   :  { %2038 = vmatprep.subr.mxu1 %v2388_v25 }
 0x1b5   :  { %2036 = vmatmul.mubr.msk.f32.vlgmr.msra.gmra.mrb[2].mxu1 %vm385_vm2, %v178_v32 }
 0x1b6   :  { %2040 = vmatprep.mubr.msk.f32.mxu1 %vm2389_vm1, %v2388_v25 }
 0x1b7   :  { %v2032_v52 = vpop.f32.mrb[2].mxu0 }
 0x1b8   :  { %v376_v53 = vpop.f32.mrb[3].mxu0 }
 0x288   :  { %v458_v43 = vpop.f32.mrb[2].mxu1 }
 0x289   :  { %v2037_v44 = vpop.f32.mrb[3].mxu1  ;;  %v462_v45 = vsel %vm385_vm2, %v458_v43, -inf }
 0x28a   :  { %463 = vmax.xlane.f32.xlu1 %v462_v45 }
 0x29b   :  { %551 = vrot.lane.b32.xlu1 %v281_v31, %s2391_s29 }
 0x29f   :  { %549 = vrot.lane.b32.xlu1 %v178_v32, %s2391_s29 }
 0x2a3   :  { %718 = vrot.lane.b32.xlu1 %v178_v32, %s2392_s3 }
 0x2a7   :  { %886 = vrot.lane.b32.xlu1 %v178_v32, %s2393_s21 }
 0x2ab   :  { %1234 = vrot.lane.b32.xlu1 %v183_v46, %s2391_s29 }
 0x2af   :  { %1403 = vrot.lane.b32.xlu1 %v183_v46, %s2392_s3 }
 0x2b3   :  { %1571 = vrot.lane.b32.xlu1 %v183_v46, %s2393_s21 }
 0x317   :  { %v464_v47 = vpop.xlane.xlu1 %463 }
 0x318   :  { %v465_v48 = vsub.f32 %v458_v43, %v464_v47 }
 0x31a   :  { %v466_v49 = vmul.f32 1.442695, %v465_v48 }
 0x31b   :  { %v552_v55 = vpop.permute.xlu1 %551 }
 0x31c   :  { %2204 = vpow2.f32 %v466_v49 }
 0x31f   :  { %v550_v57 = vpop.permute.xlu1 %549 }
 0x323   :  { %v719_v61 = vpop.permute.xlu1 %718 }
 0x326   :  { %v2205_v50 = vpop.eup %2204 }
 0x327   :  { %v468_v51 = vsel %vm385_vm2, %v2205_v50, 0.0  ;;  %v887_v2 = vpop.permute.xlu1 %886 }
 0x328   :  { %469 = vadd.xlane.f32.xlu0 %v468_v51 }
 0x32b   :  { %v1235_v8 = vpop.permute.xlu1 %1234 }
 0x32f   :  { %v1404_v13 = vpop.permute.xlu1 %1403 }
 0x333   :  { %v1572_v16 = vpop.permute.xlu1 %1571 }
 0x33e   :  { %301 = vrot.lane.b32.xlu0 %v2533_v15, %s2390_s28 }
 0x342   :  { %720 = vrot.lane.b32.xlu0 %v281_v31, %s2392_s3 }
 0x346   :  { %888 = vrot.lane.b32.xlu0 %v281_v31, %s2393_s21 }
 0x34a   :  { %1236 = vrot.lane.b32.xlu0 %v286_v54, %s2391_s29 }
 0x34e   :  { %1405 = vrot.lane.b32.xlu0 %v286_v54, %s2392_s3 }
 0x352   :  { %1573 = vrot.lane.b32.xlu0 %v286_v54, %s2393_s21 }
 0x3b5   :  { %v470_v56 = vpop.xlane.xlu0 %469 }
 0x3b6   :  { %2206 = vrcp.f32 %v470_v56 }
 0x3b9   :  { %v302_v58 = vpop.permute.xlu0 %301 }
 0x3ba   :  { %v2574_v59 = vadd.f32 %v2032_v52, %v302_v58  ;;  %v2576_v60 = vadd.f32 %v376_v53, %v302_v58 }
 0x3bc   :  { %2039 = vmatpush3.msra.mxu1 %v2576_v60 }
 0x3bd   :  { %v721_v62 = vpop.permute.xlu0 %720  ;;  %2043 = vmatprep.subr.mxu1 %v2388_v25 }
 0x3be   :  { %2054 = vmatpush3.xpose.msk.msra.mxu0 %vm385_vm2, %v721_v62 }
 0x3bf   :  { %2063 = vmatprep.subr.mxu0 %v2388_v25 }
 0x3c0   :  { %v2207_v63 = vpop.eup %2206 }
 0x3c1   :  { %v472_v0 = vmul.f32 %v2207_v63, %v470_v56  ;;  %v889_v1 = vpop.permute.xlu0 %888  ;;  %2056 = vmatmul.mubr.msk.f32.vlgmr.msra.gmra.mrb[4].mxu0 %vm385_vm2, %v719_v61 }
 0x3c2   :  { %2064 = vmatpush3.xpose.msk.msra.mxu0 %vm385_vm2, %v889_v1  ;;  %2065 = vmatprep.mubr.msk.f32.mxu0 %vm2389_vm1, %v2388_v25 }
 0x3c3   :  { %v473_v4 = vsub.f32 2.0, %v472_v0  ;;  %2073 = vmatprep.subr.mxu0 %v2388_v25 }
 0x3c5   :  { %v474_v5 = vmul.f32 %v2207_v63, %v473_v4  ;;  %v1237_v6 = vpop.permute.xlu0 %1236  ;;  %2066 = vmatmul.mubr.msk.f32.vlgmr.msra.gmra.mrb[6].mxu0 %vm385_vm2, %v887_v2 }
 0x3c6   :  { %2074 = vmatpush3.xpose.msk.msra.mxu0 %vm385_vm2, %v286_v54  ;;  %2075 = vmatprep.mubr.msk.f32.mxu0 %vm2389_vm1, %v2388_v25 }
 0x3c7   :  { %v475_v7 = vmul.f32 %v2205_v50, %v474_v5  ;;  %2083 = vmatprep.subr.mxu0 %v2388_v25 }
 0x3c9   :  { %2041 = vmatmul.mubr.msk.f32.vlgmr.msra.gmra.mrb[4].mxu1 %vm385_vm2, %v475_v7  ;;  %2076 = vmatmul.mubr.msk.f32.vlgmr.msra.gmra.mrb[8].mxu0 %vm385_vm2, %v183_v46  ;;  %v1406_v9 = vpop.permute.xlu0 %1405 }
 0x3ca   :  { %2044 = vmatpush3.xpose.msk.msra.mxu1 %vm385_vm2, %v552_v55  ;;  %2084 = vmatpush3.xpose.msk.msra.mxu0 %vm385_vm2, %v1237_v6 }
 0x3cb   :  { %2045 = vmatprep.mubr.msk.f32.mxu1 %vm2389_vm1, %v2388_v25  ;;  %2085 = vmatprep.mubr.msk.f32.mxu0 %vm2389_vm1, %v2388_v25 }
 0x3cc   :  { %2093 = vmatprep.subr.mxu0 %v2388_v25  ;;  %2048 = vmatprep.subr.mxu1 %v2388_v25 }
 0x3cd   :  { %2046 = vmatmul.mubr.msk.f32.vlgmr.msra.gmra.mrb[6].mxu1 %vm385_vm2, %v550_v57  ;;  %2086 = vmatmul.mubr.msk.f32.vlgmr.msra.gmra.mrb[10].mxu0 %vm385_vm2, %v1235_v8  ;;  %v1574_v14 = vpop.permute.xlu0 %1573 }
 0x3ce   :  { %2094 = vmatpush3.xpose.msk.msra.mxu0 %vm385_vm2, %v1406_v9  ;;  %2095 = vmatprep.mubr.msk.f32.mxu0 %vm2389_vm1, %v2388_v25 }
 0x3cf   :  { %2103 = vmatprep.subr.mxu0 %v2388_v25  ;;  %2050 = vmatprep.mubr.msk.f32.mxu1 %vm2389_vm1, %v2388_v25 }
 0x3d1   :  { %2096 = vmatmul.mubr.msk.f32.vlgmr.msra.gmra.mrb[12].mxu0 %vm385_vm2, %v1404_v13 }
 0x3d2   :  { %2104 = vmatpush3.xpose.msk.msra.mxu0 %vm385_vm2, %v1574_v14  ;;  %2105 = vmatprep.mubr.msk.f32.mxu0 %vm2389_vm1, %v2388_v25 }
 0x3d5   :  { %2106 = vmatmul.mubr.msk.f32.vlgmr.msra.gmra.mrb[14].mxu0 %vm385_vm2, %v1572_v16 }
 0x494   :  { %v792_v17 = vpop.f32.mrb[4].mxu0 }
 0x495   :  { %v2057_v18 = vpop.f32.mrb[5].mxu0  ;;  %v796_v19 = vsel %vm385_vm2, %v792_v17, -inf }
 0x496   :  { %797 = vmax.xlane.f32.xlu1 %v796_v19 }
 0x498   :  { %v960_v20 = vpop.f32.mrb[6].mxu0 }
 0x499   :  { %v2067_v21 = vpop.f32.mrb[7].mxu0  ;;  %v964_v35 = vsel %vm385_vm2, %v960_v20, -inf }
 0x49c   :  { %v2616_v22 = vpop.f32.mrb[4].mxu1  ;;  %v1143_v23 = vpop.f32.mrb[8].mxu0 }
 0x49d   :  { %v2042_v24 = vpop.f32.mrb[5].mxu1  ;;  %v2077_v26 = vpop.f32.mrb[9].mxu0  ;;  %v1147_v39 = vsel %vm385_vm2, %v1143_v23, -inf }
 0x4a0   :  { %v623_v27 = vpop.f32.mrb[6].mxu1  ;;  %v1308_v28 = vpop.f32.mrb[10].mxu0 }
 0x4a1   :  { %v2047_v29 = vpop.f32.mrb[7].mxu1  ;;  %v2087_v30 = vpop.f32.mrb[11].mxu0  ;;  %v1312_v31 = vsel %vm385_vm2, %v1308_v28, -inf  ;;  %v627_v32 = vsel %vm385_vm2, %v623_v27, -inf }
 0x4a2   :  { %1313 = vmax.xlane.f32.xlu1 %v1312_v31  ;;  %628 = vmax.xlane.f32.xlu0 %v627_v32 }
 0x4a4   :  { %v1477_v33 = vpop.f32.mrb[12].mxu0 }
 0x4a5   :  { %v2097_v34 = vpop.f32.mrb[13].mxu0  ;;  %v1481_v40 = vsel %vm385_vm2, %v1477_v33, -inf }
 0x4a6   :  { %965 = vmax.xlane.f32.xlu0 %v964_v35 }
 0x4a8   :  { %v1645_v36 = vpop.f32.mrb[14].mxu0 }
 0x4a9   :  { %v2107_v37 = vpop.f32.mrb[15].mxu0  ;;  %v1649_v38 = vsel %vm385_vm2, %v1645_v36, -inf }
 0x4aa   :  { %1650 = vmax.xlane.f32.xlu1 %v1649_v38  ;;  %1148 = vmax.xlane.f32.xlu0 %v1147_v39 }
 0x4ae   :  { %1482 = vmax.xlane.f32.xlu0 %v1481_v40 }
 0x523   :  { %v798_v41 = vpop.xlane.xlu1 %797 }
 0x524   :  { %v799_v42 = vsub.f32 %v792_v17, %v798_v41 }
 0x526   :  { %v800_v43 = vmul.f32 1.442695, %v799_v42 }
 0x528   :  { %2208 = vpow2.f32 %v800_v43 }
 0x52f   :  { %v629_v44 = vpop.xlane.xlu0 %628  ;;  %v1314_v47 = vpop.xlane.xlu1 %1313 }
 0x530   :  { %v630_v46 = vsub.f32 %v623_v27, %v629_v44  ;;  %v1315_v51 = vsub.f32 %v1308_v28, %v1314_v47 }
 0x532   :  { %v2624_v45 = vpop.eup %2208  ;;  %v631_v52 = vmul.f32 1.442695, %v630_v46  ;;  %v1316_v57 = vmul.f32 1.442695, %v1315_v51 }
 0x533   :  { %v966_v48 = vpop.xlane.xlu0 %965  ;;  %v802_v49 = vsel %vm385_vm2, %v2624_v45, 0.0 }
 0x534   :  { %v967_v50 = vsub.f32 %v960_v20, %v966_v48  ;;  %803 = vadd.xlane.f32.xlu1 %v802_v49 }
 0x536   :  { %v968_v53 = vmul.f32 1.442695, %v967_v50 }
 0x537   :  { %v1651_v54 = vpop.xlane.xlu1 %1650  ;;  %v1149_v55 = vpop.xlane.xlu0 %1148 }
 0x538   :  { %2210 = vpow2.f32 %v968_v53  ;;  %v1150_v56 = vsub.f32 %v1143_v23, %v1149_v55  ;;  %v1652_v58 = vsub.f32 %v1645_v36, %v1651_v54 }
 0x539   :  { %2212 = vpow2.f32 %v631_v52 }
 0x53a   :  { %v1151_v61 = vmul.f32 1.442695, %v1150_v56  ;;  %v1653_v0 = vmul.f32 1.442695, %v1652_v58 }
 0x53b   :  { %v1483_v62 = vpop.xlane.xlu0 %1482 }
 0x53c   :  { %v1484_v63 = vsub.f32 %v1477_v33, %v1483_v62  ;;  %2214 = vpow2.f32 %v1151_v61 }
 0x53d   :  { %2216 = vpow2.f32 %v1316_v57 }
 0x53e   :  { %v1485_v1 = vmul.f32 1.442695, %v1484_v63 }
 0x540   :  { %2218 = vpow2.f32 %v1485_v1 }
 0x541   :  { %2220 = vpow2.f32 %v1653_v0 }
 0x542   :  { %v2628_v2 = vpop.eup %2210 }
 0x543   :  { %v970_v4 = vsel %vm385_vm2, %v2628_v2, 0.0  ;;  %v2213_v5 = vpop.eup %2212 }
 0x544   :  { %971 = vadd.xlane.f32.xlu0 %v970_v4  ;;  %v633_v7 = vsel %vm385_vm2, %v2213_v5, 0.0 }
 0x546   :  { %v2632_v6 = vpop.eup %2214 }
 0x547   :  { %v2635_v8 = vpop.eup %2216  ;;  %v1153_v9 = vsel %vm385_vm2, %v2632_v6, 0.0 }
 0x548   :  { %634 = vadd.xlane.f32.xlu0 %v633_v7  ;;  %1154 = vadd.xlane.f32.xlu1 %v1153_v9  ;;  %v1318_v14 = vsel %vm385_vm2, %v2635_v8, 0.0 }
 0x54a   :  { %v2639_v13 = vpop.eup %2218 }
 0x54b   :  { %v1487_v16 = vsel %vm385_vm2, %v2639_v13, 0.0  ;;  %v2645_v17 = vpop.eup %2220 }
 0x54c   :  { %1319 = vadd.xlane.f32.xlu0 %v1318_v14  ;;  %1488 = vadd.xlane.f32.xlu1 %v1487_v16  ;;  %v1655_v18 = vsel %vm385_vm2, %v2645_v17, 0.0 }
 0x550   :  { %1656 = vadd.xlane.f32.xlu0 %v1655_v18 }
 0x55d   :  { %642 = vrot.lane.b32.xlu1 %v2576_v60, %s2391_s29 }
 0x561   :  { %978 = vrot.lane.b32.xlu1 %v2576_v60, %s2393_s21 }
 0x565   :  { %1327 = vrot.lane.b32.xlu1 %v2574_v59, %s2391_s29 }
 0x566   :  { %810 = vrot.lane.b32.xlu0 %v2576_v60, %s2392_s3 }
 0x569   :  { %1663 = vrot.lane.b32.xlu1 %v2574_v59, %s2393_s21 }
 0x56a   :  { %1495 = vrot.lane.b32.xlu0 %v2574_v59, %s2392_s3 }
 0x56d   :  { %2200 = vrot.lane.b32.xlu1 %v2522_v10, %s2394_s7 }
 0x56e   :  { %2195 = vrot.lane.b32.xlu0 %v2517_v3, %s2394_s7 }
 0x5c1   :  { %v804_v19 = vpop.xlane.xlu1 %803 }
 0x5c2   :  { %2222 = vrcp.f32 %v804_v19 }
 0x5cc   :  { %v2223_v26 = vpop.eup %2222 }
 0x5cd   :  { %v806_v29 = vmul.f32 %v2223_v26, %v804_v19 }
 0x5cf   :  { %v807_v31 = vsub.f32 2.0, %v806_v29 }
 0x5d1   :  { %v972_v20 = vpop.xlane.xlu0 %971  ;;  %v808_v37 = vmul.f32 %v2223_v26, %v807_v31 }
 0x5d2   :  { %2224 = vrcp.f32 %v972_v20 }
 0x5d3   :  { %v809_v43 = vmul.f32 %v2624_v45, %v808_v37 }
 0x5d5   :  { %v635_v21 = vpop.xlane.xlu0 %634  ;;  %v1155_v23 = vpop.xlane.xlu1 %1154 }
 0x5d6   :  { %2226 = vrcp.f32 %v635_v21 }
 0x5d7   :  { %2228 = vrcp.f32 %v1155_v23 }
 0x5d9   :  { %v1489_v24 = vpop.xlane.xlu1 %1488  ;;  %v1320_v60 = vpop.xlane.xlu0 %1319 }
 0x5da   :  { %2230 = vrcp.f32 %v1320_v60 }
 0x5db   :  { %2232 = vrcp.f32 %v1489_v24 }
 0x5dc   :  { %v2225_v28 = vpop.eup %2224 }
 0x5dd   :  { %v643_v27 = vpop.permute.xlu1 %642  ;;  %v974_v32 = vmul.f32 %v2225_v28, %v972_v20  ;;  %v1657_v34 = vpop.xlane.xlu0 %1656 }
 0x5de   :  { %2049 = vmatpush3.msra.mxu1 %v643_v27  ;;  %2234 = vrcp.f32 %v1657_v34 }
 0x5df   :  { %2058 = vmatprep.subr.mxu1 %v2388_v25  ;;  %v975_v38 = vsub.f32 2.0, %v974_v32 }
 0x5e0   :  { %v2227_v30 = vpop.eup %2226 }
 0x5e1   :  { %v637_v3 = vmul.f32 %v2227_v30, %v635_v21  ;;  %v2229_v35 = vpop.eup %2228  ;;  %v811_v42 = vpop.permute.xlu0 %810  ;;  %v976_v44 = vmul.f32 %v2225_v28, %v975_v38 }
 0x5e2   :  { %v1157_v39 = vmul.f32 %v2229_v35, %v1155_v23  ;;  %v979_v49 = vpop.permute.xlu1 %978 }
 0x5e3   :  { %v638_v33 = vsub.f32 2.0, %v637_v3  ;;  %v977_v50 = vmul.f32 %v2628_v2, %v976_v44 }
 0x5e4   :  { %v2231_v41 = vpop.eup %2230  ;;  %v1158_v46 = vsub.f32 2.0, %v1157_v39 }
 0x5e5   :  { %v639_v36 = vmul.f32 %v2227_v30, %v638_v33  ;;  %v1322_v47 = vmul.f32 %v2231_v41, %v1320_v60  ;;  %v2233_v48 = vpop.eup %2232  ;;  %v1496_v63 = vpop.permute.xlu0 %1495 }
 0x5e6   :  { %v1159_v51 = vmul.f32 %v2229_v35, %v1158_v46  ;;  %v1491_v52 = vmul.f32 %v2233_v48, %v1489_v24  ;;  %v1328_v58 = vpop.permute.xlu1 %1327 }
 0x5e7   :  { %v640_v40 = vmul.f32 %v2213_v5, %v639_v36  ;;  %v1323_v53 = vsub.f32 2.0, %v1322_v47 }
 0x5e8   :  { %v2235_v45 = vpop.eup %2234  ;;  %v1160_v54 = vmul.f32 %v2632_v6, %v1159_v51  ;;  %v1492_v55 = vsub.f32 2.0, %v1491_v52 }
 0x5e9   :  { %2051 = vmatmul.mubr.msk.f32.vlgmr.msra.gmra.mrb[8].mxu1 %vm385_vm2, %v640_v40  ;;  %v1324_v56 = vmul.f32 %v2231_v41, %v1323_v53  ;;  %v1659_v57 = vmul.f32 %v2235_v45, %v1657_v34  ;;  %v2196_v5 = vpop.permute.xlu0 %2195 }
 0x5ea   :  { %2059 = vmatpush3.msra.mxu1 %v811_v42  ;;  %2060 = vmatprep.mubr.msk.f32.mxu1 %vm2389_vm1, %v2388_v25  ;;  %v1493_v61 = vmul.f32 %v2233_v48, %v1492_v55  ;;  %v1664_v2 = vpop.permute.xlu1 %1663  ;;  %v2198_v6 = vunpack.i.h.bf16 %v2196_v5  ;;  %v2197_v7 = vunpack.i.l.bf16 %v2196_v5  ;;  %v95_v42 = vld [vmem:[#allocation2 + $0x8] sm:$0xff] }
 0x5eb   :  { %2068 = vmatprep.subr.mxu1 %v2388_v25  ;;  %v1660_v62 = vsub.f32 2.0, %v1659_v57 }
 0x5ec   :  { %v1494_v0 = vmul.f32 %v2639_v13, %v1493_v61 }
 0x5ed   :  { %2061 = vmatmul.mubr.msk.f32.vlgmr.msra.gmra.mrb[10].mxu1 %vm385_vm2, %v809_v43  ;;  %v1661_v1 = vmul.f32 %v2235_v45, %v1660_v62 }
 0x5ee   :  { %2069 = vmatpush3.msra.mxu1 %v979_v49  ;;  %2070 = vmatprep.mubr.msk.f32.mxu1 %vm2389_vm1, %v2388_v25  ;;  %v2201_v9 = vpop.permute.xlu1 %2200 }
 0x5ef   :  { %2078 = vmatprep.subr.mxu1 %v2388_v25  ;;  %v1662_v4 = vmul.f32 %v2645_v17, %v1661_v1  ;;  %v2203_v13 = vunpack.i.h.bf16 %v2201_v9  ;;  %v2202_v14 = vunpack.i.l.bf16 %v2201_v9 }
 0x5f1   :  { %2071 = vmatmul.mubr.msk.f32.vlgmr.msra.gmra.mrb[12].mxu1 %vm385_vm2, %v977_v50  ;;  %v2152_v16 = vpack.c.bf16 %v2203_v13, %v2202_v14 }
 0x5f2   :  { %2079 = vmatpush3.msra.mxu1 %v2574_v59  ;;  %2080 = vmatprep.mubr.msk.f32.mxu1 %vm2389_vm1, %v2388_v25  ;;  %v1325_v59 = vmul.f32 %v2635_v8, %v1324_v56  ;;  %v2148_v8 = vpack.c.bf16 %v2198_v6, %v2197_v7 }
 0x5f3   :  { %2088 = vmatprep.subr.mxu1 %v2388_v25 }
 0x5f4   :  { %2149 = vmatprep.subr.bf16.mxu0 %v2148_v8 }
 0x5f5   :  { %2081 = vmatmul.mubr.msk.f32.vlgmr.msra.gmra.mrb[14].mxu1 %vm385_vm2, %v1160_v54  ;;  %2151 = vmatpush3.bf16.msra.mxu0 %v2148_v8 }
 0x5f6   :  { %2089 = vmatpush3.msra.mxu1 %v1328_v58  ;;  %2090 = vmatprep.mubr.msk.f32.mxu1 %vm2389_vm1, %v2388_v25 }
 0x5f7   :  { %2098 = vmatprep.subr.mxu1 %v2388_v25  ;;  %2153 = vmatprep.subr.bf16.mxu0 %v2152_v16 }
 0x5f9   :  { %2091 = vmatmul.mubr.msk.f32.vlgmr.msra.gmra.mrb[16].mxu1 %vm385_vm2, %v1325_v59  ;;  %2155 = vmatpush3.bf16.msra.mxu0 %v2152_v16  ;;  %v1881_v59 = vsub.s32 1, %v2525_v11 }
 0x5fa   :  { %2099 = vmatpush3.msra.mxu1 %v1496_v63  ;;  %2100 = vmatprep.mubr.msk.f32.mxu1 %vm2389_vm1, %v2388_v25 }
 0x5fb   :  { %2108 = vmatprep.subr.mxu1 %v2388_v25  ;;  %v1882_v62 = vrot.slane %v2527_v12, %v1881_v59 }
 0x5fd   :  { %2101 = vmatmul.mubr.msk.f32.vlgmr.msra.gmra.mrb[18].mxu1 %vm385_vm2, %v1494_v0 }
 0x5fe   :  { %2109 = vmatpush3.msra.mxu1 %v1664_v2  ;;  %2110 = vmatprep.mubr.msk.f32.mxu1 %vm2389_vm1, %v2388_v25 }
 0x601   :  { %2111 = vmatmul.mubr.msk.f32.vlgmr.msra.gmra.mrb[20].mxu1 %vm385_vm2, %v1662_v4 }
 0x6bc   :  { %v714_v25 = vpop.f32.mrb[8].mxu1 }
 0x6bd   :  { %1055 = vrot.lane.b32.xlu0 %v714_v25, %s2383_s6  ;;  %v2052_v17 = vpop.f32.mrb[9].mxu1 }
 0x6c0   :  { %v882_v18 = vpop.f32.mrb[10].mxu1 }
 0x6c1   :  { %1059 = vrot.lane.b32.xlu1 %v882_v18, %s2395_s8  ;;  %v2062_v10 = vpop.f32.mrb[11].mxu1 }
 0x6c4   :  { %v1050_v19 = vpop.f32.mrb[12].mxu1 }
 0x6c5   :  { %1063 = vrot.lane.b32.xlu1 %v1050_v19, %s2396_s9  ;;  %v2072_v20 = vpop.f32.mrb[13].mxu1 }
 0x6c8   :  { %v1230_v21 = vpop.f32.mrb[14].mxu1 }
 0x6c9   :  { %v2082_v23 = vpop.f32.mrb[15].mxu1 }
 0x6cc   :  { %v1399_v24 = vpop.f32.mrb[16].mxu1 }
 0x6cd   :  { %1740 = vrot.lane.b32.xlu0 %v1399_v24, %s2383_s6  ;;  %v2092_v60 = vpop.f32.mrb[17].mxu1 }
 0x6d0   :  { %v1567_v26 = vpop.f32.mrb[18].mxu1 }
 0x6d1   :  { %1744 = vrot.lane.b32.xlu0 %v1567_v26, %s2395_s8  ;;  %v2102_v27 = vpop.f32.mrb[19].mxu1 }
 0x6d4   :  { %v1735_v28 = vpop.f32.mrb[20].mxu1 }
 0x6d5   :  { %1748 = vrot.lane.b32.xlu1 %v1735_v28, %s2396_s9  ;;  %v2112_v29 = vpop.f32.mrb[21].mxu1  ;;  %1766 = vrot.lane.b32.xlu0 %v2533_v15, %s2394_s7 }
 0x72f   :  { %v1056_v30 = vpop.permute.xlu0 %1055 }
 0x730   :  { %v1066_v31 = vsel %vm385_vm2, %v2616_v22, %v1056_v30  ;;  %v94_v22 = vld [vmem:[#allocation2] sm:$0xff] }
 0x733   :  { %v1060_v3 = vpop.permute.xlu1 %1059 }
 0x734   :  { %v1068_v32 = vsel %vm1067_vm3, %v1066_v31, %v1060_v3 }
 0x737   :  { %v1064_v33 = vpop.permute.xlu1 %1063 }
 0x738   :  { %v1070_v34 = vsel %vm1069_vm4, %v1068_v32, %v1064_v33 }
 0x739   :  { %2121 = vmatprep.mubr.msk.f32.mxu0 %vm104_vm0, %v1070_v34 }
 0x73f   :  { %v1741_v35 = vpop.permute.xlu0 %1740 }
 0x740   :  { %v1751_v37 = vsel %vm385_vm2, %v1230_v21, %v1741_v35 }
 0x743   :  { %v1745_v36 = vpop.permute.xlu0 %1744 }
 0x744   :  { %v1752_v38 = vsel %vm1067_vm3, %v1751_v37, %v1745_v36 }
 0x747   :  { %v1749_v39 = vpop.permute.xlu1 %1748  ;;  %v1767_v15 = vpop.permute.xlu0 %1766 }
 0x748   :  { %v1753_v40 = vsel %vm1069_vm4, %v1752_v38, %v1749_v39 }
 0x749   :  { %2122 = vmatmul.mubr.msk.f32.vlgmr.msra.gmra.mrb[16].mxu0 %vm104_vm0, %v1753_v40 }
 0x81c   :  { %v2123_v41 = vpop.f32.mrb[16].mxu0 }
 0x81d   :  { %v1847_v43 = vadd.f32 %v2123_v41, %v1767_v15  ;;  %v1841_v44 = vpop.f32.mrb[17].mxu0 }
 0x81e   :  { %v1842_v46 = vadd.f32 %v1841_v44, %v1767_v15 }
 0x81f   :  { %v1851_v47 = vadd.f32 %v1847_v43, %v95_v42 }
 0x820   :  { %v1850_v48 = vadd.f32 %v1842_v46, %v94_v22 }
 0x821   :  { %v1855_v49 = vsel %vm104_vm0, %v1851_v47, 0.0 }
 0x822   :  { %1856 = vadd.xlane.f32.xlu0 %v1855_v49  ;;  %v1852_v50 = vsel %vm104_vm0, %v1850_v48, 0.0 }
 0x823   :  { %1853 = vadd.xlane.f32.xlu1 %v1852_v50 }
 0x8af   :  { %v1857_v51 = vpop.xlane.xlu0 %1856 }
 0x8b0   :  { %v1860_v52 = vmul.f32 0.03125, %v1857_v51  ;;  %v1854_v53 = vpop.xlane.xlu1 %1853 }
 0x8b1   :  { %v1859_v45 = vmul.f32 0.03125, %v1854_v53 }
 0x8b2   :  { %v1862_v54 = vsub.f32 %v1851_v47, %v1860_v52 }
 0x8b3   :  { %v1861_v55 = vsub.f32 %v1850_v48, %v1859_v45 }
 0x8b4   :  { %v1864_v56 = vmul.f32 %v1862_v54, %v1862_v54 }
 0x8b5   :  { %v1863_v57 = vmul.f32 %v1861_v55, %v1861_v55 }
 0x8b6   :  { %v1868_v58 = vsel %vm104_vm0, %v1864_v56, 0.0 }
 0x8b7   :  { %1869 = vadd.xlane.f32.xlu1 %v1868_v58  ;;  %v1865_v61 = vsel %vm104_vm0, %v1863_v57, 0.0 }
 0x8b8   :  { %1866 = vadd.xlane.f32.xlu0 %v1865_v61 }
 0x8ce   :  { %1886 = vrot.lane.b32.xlu0 %v1882_v62, %s2387_s4 }
 0x944   :  { %v1870_v63 = vpop.xlane.xlu1 %1869 }
 0x945   :  { %v1872_v0 = vmul.f32 0.03125, %v1870_v63  ;;  %v1867_v1 = vpop.xlane.xlu0 %1866 }
 0x946   :  { %v1871_v2 = vmul.f32 0.03125, %v1867_v1 }
 0x947   :  { %v1874_v4 = vadd.f32 1e-05, %v1872_v0 }
 0x948   :  { %v1873_v5 = vadd.f32 1e-05, %v1871_v2 }
 0x949   :  { %2236 = vrsqrt.f32 %v1874_v4  ;;  %v1887_v13 = vpop.permute.xlu0 %1886 }
 0x94a   :  { %2238 = vrsqrt.f32 %v1873_v5 }
 0x953   :  { %v2237_v6 = vpop.eup %2236 }
 0x954   :  { %v2239_v7 = vpop.eup %2238  ;;  %v1878_v8 = vmul.f32 %v2237_v6, %v1862_v54 }
 0x955   :  { %v1877_v9 = vmul.f32 %v2239_v7, %v1861_v55 }
 0x956   :  { %v1884_v14 = vmul.f32 %v1882_v62, %v1878_v8 }
 0x957   :  { %v1883_v11 = vmul.f32 %v1882_v62, %v1877_v9 }
 0x958   :  { %v1890_v12 = vadd.f32 %v1887_v13, %v1884_v14 }
 0x959   :  { %v1889_v16 = vadd.f32 %v1887_v13, %v1883_v11 }
 0x95a   :  { %1892 = vst.msk [vmem:[#allocation11 + $0x8] sm:$0xff] %vm104_vm0, %v1890_v12 }
 0x95b   :  { %1891 = vst.msk [vmem:[#allocation11] sm:$0xff] %vm104_vm0, %v1889_v16 }
 0x95c   :  { %2361 = shalt.err (!%p2358_p2)
}
 0x95d   :  { %s2362_s15 = scalar_lea.hbm %s2735_s5, 256 }
 0x95e   :  { %p2363_p3 = scmp.ne.s32.totalorder %s2735_s5, %s2362_s15  ;;  %p2366_p4 = scmp.lt.u32.totalorder %s2362_s15, %s2735_s5 }
 0x960   :  { %p2368_p5 = pnand %p2366_p4, %p2363_p3 }
 0x962   :  { %2371 = shalt.err (!%p2368_p5)
}
 0x963   :  { %1904 = dma.vmem_to_hbm [thread:$0]  %s1899_s11, 256, %s2735_s5, [#allocation4], %s2382_s30, %s2382_s30, %s2383_s6  }
 0x964   :  { %2378 = dma.done.wait [#allocation4], 256  }
 0x965   :  { %2379 = vsyncadd [#allocation4], 4294967040 }
 0x966   :  { %1908 = vsyncpa [#allocation3], 1 }
 0x967   :  { %1909 = vsyncpa [#allocation6], 1 }
 0x968   :  { %1910 = vsyncpa [#allocation9], 1 }
 0x969   :  { %1911 = vsyncpa [#allocation4], 1 }

</bundles_post_ra>
